<compile_context>
chip_gen: v6e
topology: v6e:2x2x1
jax: 0.10.0
libtpu: 0.0.40
codegen_flags: <defaults>
</compile_context>

<pallas_src>
import functools
import math

import jax
import jax.numpy as jnp
from jax import lax
from jax.experimental import pallas as pl
from jax.experimental.pallas import tpu as pltpu

_SQRT_2_OVER_PI = math.sqrt(2.0 / math.pi)


def _gelu_tanh(x):
    # tanh-approximate GELU (transcendental on the EUP slot); cubic factored
    # as x*(c + c*0.044715*x^2) to minimise VALU ops.  |err| <= ~1e-3 vs erf.
    x2 = x * x
    inner = x * (_SQRT_2_OVER_PI + (_SQRT_2_OVER_PI * 0.044715) * x2)
    return 0.5 * x * (1.0 + jnp.tanh(inner))


def mlp_kernel(*refs, has_halo):
    # has_halo=True  refs: xc, xu, xd, w1, b1, wd, bd, w2, b2, o, hbuf
    # has_halo=False refs: xc,         w1, b1, wd, bd, w2, b2, o, hbuf
    #
    # xc: (TB, TH, W, Cin) bf16   centre rows of TB batch images
    # xu: (TB, 1,  W, Cin) bf16   row above the strip (clamped; zeroed at t==0)
    # xd: (TB, 1,  W, Cin) bf16   row below the strip (clamped; zeroed at t==T-1)
    # w1: (Cin, hid) bf16   b1: (1, hid) f32
    # wd: (3, 3, hid) f32   bd: (1, hid) f32   (depthwise 3x3 weights, ky,kx,C)
    # w2: (hid, Cout) bf16  b2: (1, Cout) f32
    # o : (TB, TH, W, Cout)
    # hbuf: VMEM scratch (TB, TH+2, W, hid) f32 -- fc1 output rows incl. halos
    if has_halo:
        (xc_ref, xu_ref, xd_ref, w1_ref, b1_ref, wd_ref, bd_ref,
         w2_ref, b2_ref, o_ref, hbuf) = refs
    else:
        (xc_ref, w1_ref, b1_ref, wd_ref, bd_ref,
         w2_ref, b2_ref, o_ref, hbuf) = refs

    tb, th, w, cin = xc_ref.shape
    hid = w1_ref.shape[1]
    cout = w2_ref.shape[1]

    w1 = w1_ref[...]                 # bf16
    b1 = b1_ref[...]                 # f32

    # ---- fc1: ONE tall matmul (bf16 MXU, f32 accumulation) ----------------
    if has_halo:
        t = pl.program_id(1)
        nt = pl.num_programs(1)
        # Stack rows in hbuf order: [row above; TH centre rows; row below].
        xall = jnp.concatenate([xu_ref[...], xc_ref[...], xd_ref[...]], axis=1)
        m = tb * (th + 2) * w
        h = jnp.dot(xall.reshape(m, cin), w1,
                    preferred_element_type=jnp.float32) + b1
        h = h.reshape(tb, th + 2, w, hid)
        # Conv padding=1 zero-pads the fc1 *output*: rows outside the image
        # are zero.  Mask only the two halo rows (after the bias add).
        scale_u = (t > 0).astype(jnp.float32)
        scale_d = (t < nt - 1).astype(jnp.float32)
        hbuf[:, 0:1] = h[:, 0:1] * scale_u
        hbuf[:, 1:th + 1] = h[:, 1:th + 1]
        hbuf[:, th + 1:th + 2] = h[:, th + 1:th + 2] * scale_d
    else:
        # Whole image height per step: no halo inputs, halo rows are just the
        # conv's zero padding.
        m = tb * th * w
        h = jnp.dot(xc_ref[...].reshape(m, cin), w1,
                    preferred_element_type=jnp.float32) + b1
        zrow = jnp.zeros((tb, 1, w, hid), jnp.float32)
        hbuf[:, 0:1] = zrow
        hbuf[:, 1:th + 1] = h.reshape(tb, th, w, hid)
        hbuf[:, th + 1:th + 2] = zrow

    # ---- depthwise 3x3 conv (rows x W x C; rolls on the XLU slot) ---------
    nrow = tb * th
    wd = wd_ref[...]                 # (3, 3, hid)
    bd = bd_ref[...]                 # (1, hid)

    r0 = hbuf[:, 0:th].reshape(nrow, w, hid)          # input rows y-1
    r1 = hbuf[:, 1:th + 1].reshape(nrow, w, hid)      # input rows y
    r2 = hbuf[:, 2:th + 2].reshape(nrow, w, hid)      # input rows y+1

    # Centre-column taps (+ hoisted conv bias) and the left/right partial sums
    # accumulated across ky; each horizontal tap is rolled & masked only once.
    center = r0 * wd[0, 1] + r1 * wd[1, 1] + r2 * wd[2, 1] + bd
    lsum = r0 * wd[0, 0] + r1 * wd[1, 0] + r2 * wd[2, 0]
    rsum = r0 * wd[0, 2] + r1 * wd[1, 2] + r2 * wd[2, 2]

    col = lax.broadcasted_iota(jnp.int32, (1, w, 1), 1)
    # kx = 0: value at column x comes from column x-1 (zero at x == 0).
    left = jnp.where(col > 0, pltpu.roll(lsum, shift=1, axis=1), 0.0)
    # kx = 2: value at column x comes from column x+1 (zero at x == W-1).
    right = jnp.where(col < w - 1, pltpu.roll(rsum, shift=w - 1, axis=1), 0.0)

    acc = center + left + right

    # ---- GELU + fc2 (dropout p=0.0 -> identity) ---------------------------
    y = _gelu_tanh(acc).reshape(nrow * w, hid).astype(jnp.bfloat16)
    out = jnp.dot(y, w2_ref[...], preferred_element_type=jnp.float32)
    out = out + b2_ref[...]
    o_ref[...] = out.reshape(tb, th, w, cout).astype(o_ref.dtype)


def mlp_forward(x, params, H, W, *, row_tile=None, batch_tile=None,
                vmem_limit_bytes=48 * 1024 * 1024):
    """x: (B, N, Cin) with N == H*W (row-major).  Returns (B, N, Cout)."""
    B, N, Cin = x.shape
    assert N == H * W
    w1, b1, wd, bd, w2, b2 = params
    hid = w1.shape[1]
    Cout = w2.shape[1]

    TH = H if row_tile is None else row_tile
    TB = 1 if batch_tile is None else batch_tile
    assert H % TH == 0, "row_tile must divide H"
    assert B % TB == 0, "batch_tile must divide B"
    T = H // TH
    has_halo = T > 1           # TH == H: delete halo inputs / DMAs / masks.

    x4 = x.reshape(B, H, W, Cin).astype(jnp.bfloat16)   # halve input DMA bytes
    w1b = w1.astype(jnp.bfloat16)                        # cast weights once
    w2b = w2.astype(jnp.bfloat16)

    kernel = functools.partial(mlp_kernel, has_halo=has_halo)

    if has_halo:
        grid = (B // TB, T)
        zmap2 = lambda b, t: (0, 0)
        zmap3 = lambda b, t: (0, 0, 0)
        in_specs = [
            # centre rows of the strip
            pl.BlockSpec((TB, TH, W, Cin), lambda b, t: (b, t, 0, 0)),
            # row above the strip (clamped at the top border)
            pl.BlockSpec((TB, 1, W, Cin),
                         lambda b, t: (b, jnp.maximum(t * TH - 1, 0), 0, 0)),
            # row below the strip (clamped at the bottom border)
            pl.BlockSpec((TB, 1, W, Cin),
                         lambda b, t: (b, jnp.minimum((t + 1) * TH, H - 1), 0, 0)),
            pl.BlockSpec((Cin, hid), zmap2),
            pl.BlockSpec((1, hid), zmap2),
            pl.BlockSpec((3, 3, hid), zmap3),
            pl.BlockSpec((1, hid), zmap2),
            pl.BlockSpec((hid, Cout), zmap2),
            pl.BlockSpec((1, Cout), zmap2),
        ]
        out_spec = pl.BlockSpec((TB, TH, W, Cout), lambda b, t: (b, t, 0, 0))
        operands = (x4, x4, x4, w1b, b1, wd, bd, w2b, b2)
        semantics = ("parallel", "parallel")
    else:
        grid = (B // TB,)
        zmap2 = lambda b: (0, 0)
        zmap3 = lambda b: (0, 0, 0)
        in_specs = [
            pl.BlockSpec((TB, TH, W, Cin), lambda b: (b, 0, 0, 0)),
            pl.BlockSpec((Cin, hid), zmap2),
            pl.BlockSpec((1, hid), zmap2),
            pl.BlockSpec((3, 3, hid), zmap3),
            pl.BlockSpec((1, hid), zmap2),
            pl.BlockSpec((hid, Cout), zmap2),
            pl.BlockSpec((1, Cout), zmap2),
        ]
        out_spec = pl.BlockSpec((TB, TH, W, Cout), lambda b: (b, 0, 0, 0))
        operands = (x4, w1b, b1, wd, bd, w2b, b2)
        semantics = ("parallel",)

    out4 = pl.pallas_call(
        kernel,
        out_shape=jax.ShapeDtypeStruct((B, H, W, Cout), x.dtype),
        grid_spec=pltpu.PrefetchScalarGridSpec(
            num_scalar_prefetch=0,
            grid=grid,
            in_specs=in_specs,
            out_specs=out_spec,
            scratch_shapes=[pltpu.VMEM((TB, TH + 2, W, hid), jnp.float32)],
        ),
        compiler_params=pltpu.CompilerParams(
            dimension_semantics=semantics,
            vmem_limit_bytes=vmem_limit_bytes,
        ),
    )(*operands)
    return out4.reshape(B, N, Cout)


def mlp_reference(x, params, H, W):
    """Pure-JAX f32 reference matching the PyTorch Mlp forward (drop=0)."""
    w1, b1, wd, bd, w2, b2 = params
    B, N, Cin = x.shape
    hid = w1.shape[1]
    h = x @ w1 + b1                                        # fc1
    himg = h.reshape(B, H, W, hid)
    hp = jnp.pad(himg, ((0, 0), (1, 1), (1, 1), (0, 0)))   # conv padding=1
    acc = bd.reshape(1, 1, 1, hid)
    for ky in range(3):
        for kx in range(3):
            acc = acc + hp[:, ky:ky + H, kx:kx + W, :] * wd[ky, kx]
    y = jax.nn.gelu(acc, approximate=False)                # nn.GELU (erf)
    return y.reshape(B, N, hid) @ w2 + b2                  # fc2


def init_params(key, in_features, hidden_features, out_features):
    """Deterministic synthetic params mirroring Mlp._init_weights shapes."""
    k1, k2, k3 = jax.random.split(key, 3)
    # nn.Linear: trunc_normal(std=0.02), bias = 0.  Stored (in, out) so the
    # kernel computes x @ W.
    w1 = 0.02 * jax.random.truncated_normal(
        k1, -2.0, 2.0, (in_features, hidden_features), jnp.float32)
    b1 = jnp.zeros((1, hidden_features), jnp.float32)
    # Depthwise Conv2d(dim, dim, 3, groups=dim): normal(0, sqrt(2/fan_out)),
    # fan_out = 9; bias = 0.  Stored as (kh, kw, dim): wd[i,j,c] == torch_w[c,0,i,j].
    wd = math.sqrt(2.0 / 9.0) * jax.random.normal(
        k2, (3, 3, hidden_features), jnp.float32)
    bd = jnp.zeros((1, hidden_features), jnp.float32)
    w2 = 0.02 * jax.random.truncated_normal(
        k3, -2.0, 2.0, (hidden_features, out_features), jnp.float32)
    b2 = jnp.zeros((1, out_features), jnp.float32)
    return (w1, b1, wd, bd, w2, b2)


if __name__ == "__main__":
    B, H, W = 2, 8, 8
    N = H * W
    # Lane-dense channel sizes (multiples of 128).
    in_features, hidden_features, out_features = 128, 256, 128

    key = jax.random.PRNGKey(0)
    kx, kp = jax.random.split(key)
    x = jax.random.normal(kx, (B, N, in_features), jnp.float32)
    params = init_params(kp, in_features, hidden_features, out_features)

    ref = mlp_reference(x, params, H, W)

    # Path 1: whole image per step, 2 images per block -> M = 128, no halo
    # recompute at all (fc1 fused into one tall matmul).
    out_full = mlp_forward(x, params, H, W, row_tile=H, batch_tile=2)

    # Path 2: 4-row strips with recomputed fc1 halos (grid = (2, 2)); checks
    # the halo/border handling and megacore-friendly 2-D parallel grid.
    out_strip = mlp_forward(x, params, H, W, row_tile=4, batch_tile=1)

    out_full, out_strip, ref = jax.block_until_ready((out_full, out_strip, ref))

    assert out_full.shape == (B, N, out_features)
    assert bool(jnp.all(jnp.isfinite(out_full)))
    assert bool(jnp.all(jnp.isfinite(out_strip)))
    # bf16 matmul operands + tanh-GELU vs the f32/erf reference: ~1e-3 error.
    err_full = float(jnp.max(jnp.abs(out_full - ref)))
    err_strip = float(jnp.max(jnp.abs(out_strip - ref)))
    assert bool(jnp.allclose(out_full, ref, atol=2e-2, rtol=2e-2)), err_full
    assert bool(jnp.allclose(out_strip, ref, atol=2e-2, rtol=2e-2)), err_strip
    print("KERNEL_OK")
</pallas_src>

<mosaic_0001>
module attributes {stable_mosaic.version = 11 : i64} {
  func.func @mlp_kernel(%arg0: i32, %arg1: memref<2x8x8x128xbf16, #tpu.memory_space<vmem>>, %arg2: memref<128x256xbf16, #tpu.memory_space<vmem>>, %arg3: memref<1x256xf32, #tpu.memory_space<vmem>>, %arg4: memref<3x3x256xf32, #tpu.memory_space<vmem>>, %arg5: memref<1x256xf32, #tpu.memory_space<vmem>>, %arg6: memref<256x128xbf16, #tpu.memory_space<vmem>>, %arg7: memref<1x128xf32, #tpu.memory_space<vmem>>, %arg8: memref<2x8x8x128xf32, #tpu.memory_space<vmem>>, %arg9: memref<2x10x8x256xf32, #tpu.memory_space<vmem>>) attributes {dimension_semantics = [#tpu.dimension_semantics<parallel>], iteration_bounds = array<i64: 1>, scalar_prefetch = 0 : i64, scratch_operands = 1 : i64, tpu.core_type = #tpu.core_type<tc>, window_params = [{transform_indices = @transform_0, window_bounds = array<i64: 2, 8, 8, 128>}, {pipeline_mode = #tpu.pipeline_mode<synchronous>, transform_indices = @transform_1, window_bounds = array<i64: 128, 256>}, {pipeline_mode = #tpu.pipeline_mode<synchronous>, transform_indices = @transform_2, window_bounds = array<i64: 1, 256>}, {pipeline_mode = #tpu.pipeline_mode<synchronous>, transform_indices = @transform_3, window_bounds = array<i64: 3, 3, 256>}, {pipeline_mode = #tpu.pipeline_mode<synchronous>, transform_indices = @transform_4, window_bounds = array<i64: 1, 256>}, {pipeline_mode = #tpu.pipeline_mode<synchronous>, transform_indices = @transform_5, window_bounds = array<i64: 256, 128>}, {pipeline_mode = #tpu.pipeline_mode<synchronous>, transform_indices = @transform_6, window_bounds = array<i64: 1, 128>}, {transform_indices = @transform_7, window_bounds = array<i64: 2, 8, 8, 128>}]} {
    %c0 = arith.constant 0 : index
    %c0_0 = arith.constant 0 : index
    %0 = vector.load %arg2[%c0, %c0_0] : memref<128x256xbf16, #tpu.memory_space<vmem>>, vector<128x256xbf16>
    %c0_1 = arith.constant 0 : index
    %c0_2 = arith.constant 0 : index
    %1 = vector.load %arg3[%c0_1, %c0_2] : memref<1x256xf32, #tpu.memory_space<vmem>>, vector<1x256xf32>
    %c0_3 = arith.constant 0 : index
    %c0_4 = arith.constant 0 : index
    %c0_5 = arith.constant 0 : index
    %c0_6 = arith.constant 0 : index
    %2 = vector.load %arg1[%c0_3, %c0_4, %c0_5, %c0_6] : memref<2x8x8x128xbf16, #tpu.memory_space<vmem>>, vector<2x8x8x128xbf16>
    %3 = vector.shape_cast %2 : vector<2x8x8x128xbf16> to vector<128x128xbf16>
    %cst = arith.constant dense<0.000000e+00> : vector<128x256xf32>
    %4 = tpu.matmul %3, %0, %cst {dimension_numbers = #tpu.dot_dimension_numbers<[1], [0], [0], [1], [0, 0, 1, 1], [], []>} : vector<128x128xbf16>, vector<128x256xbf16>, vector<128x256xf32> -> vector<128x256xf32>
    %5 = vector.broadcast %1 : vector<1x256xf32> to vector<128x256xf32>
    %6 = arith.addf %4, %5 : vector<128x256xf32>
    %cst_7 = arith.constant 0.000000e+00 : f32
    %7 = vector.broadcast %cst_7 : f32 to vector<2x1x8x256xf32>
    %c0_8 = arith.constant 0 : index
    %c0_9 = arith.constant 0 : index
    %c0_10 = arith.constant 0 : index
    %c0_11 = arith.constant 0 : index
    %8 = vector.load %arg9[%c0_8, %c0_9, %c0_10, %c0_11] : memref<2x10x8x256xf32, #tpu.memory_space<vmem>>, vector<2x1x8x256xf32>
    tpu.vector_store %arg9[%c0_8, %c0_9, %c0_10, %c0_11], %7 {strides = array<i32>} : memref<2x10x8x256xf32, #tpu.memory_space<vmem>>, vector<2x1x8x256xf32>,
    %9 = vector.shape_cast %6 : vector<128x256xf32> to vector<2x8x8x256xf32>
    %c0_12 = arith.constant 0 : index
    %c1 = arith.constant 1 : index
    %c0_13 = arith.constant 0 : index
    %c0_14 = arith.constant 0 : index
    %10 = vector.load %arg9[%c0_12, %c1, %c0_13, %c0_14] : memref<2x10x8x256xf32, #tpu.memory_space<vmem>>, vector<2x8x8x256xf32>
    tpu.vector_store %arg9[%c0_12, %c1, %c0_13, %c0_14], %9 {strides = array<i32>} : memref<2x10x8x256xf32, #tpu.memory_space<vmem>>, vector<2x8x8x256xf32>,
    %c0_15 = arith.constant 0 : index
    %c9 = arith.constant 9 : index
    %c0_16 = arith.constant 0 : index
    %c0_17 = arith.constant 0 : index
    %11 = vector.load %arg9[%c0_15, %c9, %c0_16, %c0_17] : memref<2x10x8x256xf32, #tpu.memory_space<vmem>>, vector<2x1x8x256xf32>
    tpu.vector_store %arg9[%c0_15, %c9, %c0_16, %c0_17], %7 {strides = array<i32>} : memref<2x10x8x256xf32, #tpu.memory_space<vmem>>, vector<2x1x8x256xf32>,
    %c0_18 = arith.constant 0 : index
    %c0_19 = arith.constant 0 : index
    %c0_20 = arith.constant 0 : index
    %12 = vector.load %arg4[%c0_18, %c0_19, %c0_20] : memref<3x3x256xf32, #tpu.memory_space<vmem>>, vector<3x3x256xf32>
    %c0_21 = arith.constant 0 : index
    %c0_22 = arith.constant 0 : index
    %13 = vector.load %arg5[%c0_21, %c0_22] : memref<1x256xf32, #tpu.memory_space<vmem>>, vector<1x256xf32>
    %c0_23 = arith.constant 0 : index
    %c0_24 = arith.constant 0 : index
    %c0_25 = arith.constant 0 : index
    %c0_26 = arith.constant 0 : index
    %14 = vector.load %arg9[%c0_23, %c0_24, %c0_25, %c0_26] : memref<2x10x8x256xf32, #tpu.memory_space<vmem>>, vector<2x8x8x256xf32>
    %15 = vector.shape_cast %14 : vector<2x8x8x256xf32> to vector<16x8x256xf32>
    %c0_27 = arith.constant 0 : index
    %c1_28 = arith.constant 1 : index
    %c0_29 = arith.constant 0 : index
    %c0_30 = arith.constant 0 : index
    %16 = vector.load %arg9[%c0_27, %c1_28, %c0_29, %c0_30] : memref<2x10x8x256xf32, #tpu.memory_space<vmem>>, vector<2x8x8x256xf32>
    %17 = vector.shape_cast %16 : vector<2x8x8x256xf32> to vector<16x8x256xf32>
    %c0_31 = arith.constant 0 : index
    %c2 = arith.constant 2 : index
    %c0_32 = arith.constant 0 : index
    %c0_33 = arith.constant 0 : index
    %18 = vector.load %arg9[%c0_31, %c2, %c0_32, %c0_33] : memref<2x10x8x256xf32, #tpu.memory_space<vmem>>, vector<2x8x8x256xf32>
    %19 = vector.shape_cast %18 : vector<2x8x8x256xf32> to vector<16x8x256xf32>
    %20 = vector.extract_strided_slice %12 {offsets = [0, 1, 0], sizes = [1, 1, 256], strides = [1, 1, 1]} : vector<3x3x256xf32> to vector<1x1x256xf32>
    %21 = vector.shape_cast %20 : vector<1x1x256xf32> to vector<256xf32>
    %22 = vector.shape_cast %21 : vector<256xf32> to vector<1x1x256xf32>
    %23 = vector.broadcast %22 : vector<1x1x256xf32> to vector<16x8x256xf32>
    %24 = arith.mulf %15, %23 : vector<16x8x256xf32>
    %25 = vector.extract_strided_slice %12 {offsets = [1, 1, 0], sizes = [1, 1, 256], strides = [1, 1, 1]} : vector<3x3x256xf32> to vector<1x1x256xf32>
    %26 = vector.shape_cast %25 : vector<1x1x256xf32> to vector<256xf32>
    %27 = vector.shape_cast %26 : vector<256xf32> to vector<1x1x256xf32>
    %28 = vector.broadcast %27 : vector<1x1x256xf32> to vector<16x8x256xf32>
    %29 = arith.mulf %17, %28 : vector<16x8x256xf32>
    %30 = arith.addf %24, %29 : vector<16x8x256xf32>
    %31 = vector.extract_strided_slice %12 {offsets = [2, 1, 0], sizes = [1, 1, 256], strides = [1, 1, 1]} : vector<3x3x256xf32> to vector<1x1x256xf32>
    %32 = vector.shape_cast %31 : vector<1x1x256xf32> to vector<256xf32>
    %33 = vector.shape_cast %32 : vector<256xf32> to vector<1x1x256xf32>
    %34 = vector.broadcast %33 : vector<1x1x256xf32> to vector<16x8x256xf32>
    %35 = arith.mulf %19, %34 : vector<16x8x256xf32>
    %36 = arith.addf %30, %35 : vector<16x8x256xf32>
    %37 = vector.shape_cast %13 : vector<1x256xf32> to vector<1x1x256xf32>
    %38 = vector.broadcast %37 : vector<1x1x256xf32> to vector<16x8x256xf32>
    %39 = arith.addf %36, %38 : vector<16x8x256xf32>
    %40 = vector.extract_strided_slice %12 {offsets = [0, 0, 0], sizes = [1, 1, 256], strides = [1, 1, 1]} : vector<3x3x256xf32> to vector<1x1x256xf32>
    %41 = vector.shape_cast %40 : vector<1x1x256xf32> to vector<256xf32>
    %42 = vector.shape_cast %41 : vector<256xf32> to vector<1x1x256xf32>
    %43 = vector.broadcast %42 : vector<1x1x256xf32> to vector<16x8x256xf32>
    %44 = arith.mulf %15, %43 : vector<16x8x256xf32>
    %45 = vector.extract_strided_slice %12 {offsets = [1, 0, 0], sizes = [1, 1, 256], strides = [1, 1, 1]} : vector<3x3x256xf32> to vector<1x1x256xf32>
    %46 = vector.shape_cast %45 : vector<1x1x256xf32> to vector<256xf32>
    %47 = vector.shape_cast %46 : vector<256xf32> to vector<1x1x256xf32>
    %48 = vector.broadcast %47 : vector<1x1x256xf32> to vector<16x8x256xf32>
    %49 = arith.mulf %17, %48 : vector<16x8x256xf32>
    %50 = arith.addf %44, %49 : vector<16x8x256xf32>
    %51 = vector.extract_strided_slice %12 {offsets = [2, 0, 0], sizes = [1, 1, 256], strides = [1, 1, 1]} : vector<3x3x256xf32> to vector<1x1x256xf32>
    %52 = vector.shape_cast %51 : vector<1x1x256xf32> to vector<256xf32>
    %53 = vector.shape_cast %52 : vector<256xf32> to vector<1x1x256xf32>
    %54 = vector.broadcast %53 : vector<1x1x256xf32> to vector<16x8x256xf32>
    %55 = arith.mulf %19, %54 : vector<16x8x256xf32>
    %56 = arith.addf %50, %55 : vector<16x8x256xf32>
    %57 = vector.extract_strided_slice %12 {offsets = [0, 2, 0], sizes = [1, 1, 256], strides = [1, 1, 1]} : vector<3x3x256xf32> to vector<1x1x256xf32>
    %58 = vector.shape_cast %57 : vector<1x1x256xf32> to vector<256xf32>
    %59 = vector.shape_cast %58 : vector<256xf32> to vector<1x1x256xf32>
    %60 = vector.broadcast %59 : vector<1x1x256xf32> to vector<16x8x256xf32>
    %61 = arith.mulf %15, %60 : vector<16x8x256xf32>
    %62 = vector.extract_strided_slice %12 {offsets = [1, 2, 0], sizes = [1, 1, 256], strides = [1, 1, 1]} : vector<3x3x256xf32> to vector<1x1x256xf32>
    %63 = vector.shape_cast %62 : vector<1x1x256xf32> to vector<256xf32>
    %64 = vector.shape_cast %63 : vector<256xf32> to vector<1x1x256xf32>
    %65 = vector.broadcast %64 : vector<1x1x256xf32> to vector<16x8x256xf32>
    %66 = arith.mulf %17, %65 : vector<16x8x256xf32>
    %67 = arith.addf %61, %66 : vector<16x8x256xf32>
    %68 = vector.extract_strided_slice %12 {offsets = [2, 2, 0], sizes = [1, 1, 256], strides = [1, 1, 1]} : vector<3x3x256xf32> to vector<1x1x256xf32>
    %69 = vector.shape_cast %68 : vector<1x1x256xf32> to vector<256xf32>
    %70 = vector.shape_cast %69 : vector<256xf32> to vector<1x1x256xf32>
    %71 = vector.broadcast %70 : vector<1x1x256xf32> to vector<16x8x256xf32>
    %72 = arith.mulf %19, %71 : vector<16x8x256xf32>
    %73 = arith.addf %67, %72 : vector<16x8x256xf32>
    %74 = tpu.iota {dimensions = array<i32: 1>} : vector<1x8x1xi32>
    %c0_i32 = arith.constant 0 : i32
    %75 = vector.broadcast %c0_i32 : i32 to vector<1x8x1xi32>
    %76 = arith.cmpi sgt, %74, %75 : vector<1x8x1xi32>
    %c1_i32 = arith.constant 1 : i32
    %77 = tpu.dynamic_rotate %56 by %c1_i32 dim 1 : vector<16x8x256xf32>, i32 -> vector<16x8x256xf32>
    %cst_34 = arith.constant 0.000000e+00 : f32
    %78 = vector.shape_cast %76 : vector<1x8x1xi1> to vector<1x8x1xi1>
    %79 = vector.broadcast %78 : vector<1x8x1xi1> to vector<16x8x256xi1>
    %80 = vector.broadcast %cst_34 : f32 to vector<16x8x256xf32>
    %81 = arith.select %79, %77, %80 : vector<16x8x256xi1>, vector<16x8x256xf32>
    %c7_i32 = arith.constant 7 : i32
    %82 = vector.broadcast %c7_i32 : i32 to vector<1x8x1xi32>
    %83 = arith.cmpi slt, %74, %82 : vector<1x8x1xi32>
    %c7_i32_35 = arith.constant 7 : i32
    %84 = tpu.dynamic_rotate %73 by %c7_i32_35 dim 1 : vector<16x8x256xf32>, i32 -> vector<16x8x256xf32>
    %cst_36 = arith.constant 0.000000e+00 : f32
    %85 = vector.shape_cast %83 : vector<1x8x1xi1> to vector<1x8x1xi1>
    %86 = vector.broadcast %85 : vector<1x8x1xi1> to vector<16x8x256xi1>
    %87 = vector.broadcast %cst_36 : f32 to vector<16x8x256xf32>
    %88 = arith.select %86, %84, %87 : vector<16x8x256xi1>, vector<16x8x256xf32>
    %89 = arith.addf %39, %81 : vector<16x8x256xf32>
    %90 = arith.addf %89, %88 : vector<16x8x256xf32>
    %91 = arith.mulf %90, %90 : vector<16x8x256xf32>
    %cst_37 = arith.constant 0.0356774069 : f32
    %92 = vector.broadcast %cst_37 : f32 to vector<16x8x256xf32>
    %93 = arith.mulf %92, %91 : vector<16x8x256xf32>
    %cst_38 = arith.constant 0.797884583 : f32
    %94 = vector.broadcast %cst_38 : f32 to vector<16x8x256xf32>
    %95 = arith.addf %94, %93 : vector<16x8x256xf32>
    %96 = arith.mulf %90, %95 : vector<16x8x256xf32>
    %cst_39 = arith.constant 5.000000e-01 : f32
    %97 = vector.broadcast %cst_39 : f32 to vector<16x8x256xf32>
    %98 = arith.mulf %97, %90 : vector<16x8x256xf32>
    %99 = math.tanh %96 : vector<16x8x256xf32>
    %cst_40 = arith.constant 1.000000e+00 : f32
    %100 = vector.broadcast %cst_40 : f32 to vector<16x8x256xf32>
    %101 = arith.addf %100, %99 : vector<16x8x256xf32>
    %102 = arith.mulf %98, %101 : vector<16x8x256xf32>
    %103 = vector.shape_cast %102 : vector<16x8x256xf32> to vector<128x256xf32>
    %104 = arith.truncf %103 : vector<128x256xf32> to vector<128x256xbf16>
    %c0_41 = arith.constant 0 : index
    %c0_42 = arith.constant 0 : index
    %105 = vector.load %arg6[%c0_41, %c0_42] : memref<256x128xbf16, #tpu.memory_space<vmem>>, vector<256x128xbf16>
    %cst_43 = arith.constant dense<0.000000e+00> : vector<128x128xf32>
    %106 = tpu.matmul %104, %105, %cst_43 {dimension_numbers = #tpu.dot_dimension_numbers<[1], [0], [0], [1], [0, 0, 1, 1], [], []>} : vector<128x256xbf16>, vector<256x128xbf16>, vector<128x128xf32> -> vector<128x128xf32>
    %c0_44 = arith.constant 0 : index
    %c0_45 = arith.constant 0 : index
    %107 = vector.load %arg7[%c0_44, %c0_45] : memref<1x128xf32, #tpu.memory_space<vmem>>, vector<1x128xf32>
    %108 = vector.broadcast %107 : vector<1x128xf32> to vector<128x128xf32>
    %109 = arith.addf %106, %108 : vector<128x128xf32>
    %110 = vector.shape_cast %109 : vector<128x128xf32> to vector<2x8x8x128xf32>
    %c0_46 = arith.constant 0 : index
    %c0_47 = arith.constant 0 : index
    %c0_48 = arith.constant 0 : index
    %c0_49 = arith.constant 0 : index
    %111 = vector.load %arg8[%c0_46, %c0_47, %c0_48, %c0_49] : memref<2x8x8x128xf32, #tpu.memory_space<vmem>>, vector<2x8x8x128xf32>
    tpu.vector_store %arg8[%c0_46, %c0_47, %c0_48, %c0_49], %110 {strides = array<i32>} : memref<2x8x8x128xf32, #tpu.memory_space<vmem>>, vector<2x8x8x128xf32>,
    return
  }
  func.func @transform_0(%arg0: i32) -> (i32, i32, i32, i32) {
    %c0_i32 = arith.constant 0 : i32
    %c0_i32_0 = arith.constant 0 : i32
    %c0_i32_1 = arith.constant 0 : i32
    %c0_i32_2 = arith.constant 0 : i32
    return %arg0, %c0_i32, %c0_i32_0, %c0_i32_1 : i32, i32, i32, i32
  }
  func.func @transform_1(%arg0: i32) -> (i32, i32) {
    %c0_i32 = arith.constant 0 : i32
    %c0_i32_0 = arith.constant 0 : i32
    %c0_i32_1 = arith.constant 0 : i32
    return %c0_i32, %c0_i32_0 : i32, i32
  }
  func.func @transform_2(%arg0: i32) -> (i32, i32) {
    %c0_i32 = arith.constant 0 : i32
    %c0_i32_0 = arith.constant 0 : i32
    %c0_i32_1 = arith.constant 0 : i32
    return %c0_i32, %c0_i32_0 : i32, i32
  }
  func.func @transform_3(%arg0: i32) -> (i32, i32, i32) {
    %c0_i32 = arith.constant 0 : i32
    %c0_i32_0 = arith.constant 0 : i32
    %c0_i32_1 = arith.constant 0 : i32
    %c0_i32_2 = arith.constant 0 : i32
    return %c0_i32, %c0_i32_0, %c0_i32_1 : i32, i32, i32
  }
  func.func @transform_4(%arg0: i32) -> (i32, i32) {
    %c0_i32 = arith.constant 0 : i32
    %c0_i32_0 = arith.constant 0 : i32
    %c0_i32_1 = arith.constant 0 : i32
    return %c0_i32, %c0_i32_0 : i32, i32
  }
  func.func @transform_5(%arg0: i32) -> (i32, i32) {
    %c0_i32 = arith.constant 0 : i32
    %c0_i32_0 = arith.constant 0 : i32
    %c0_i32_1 = arith.constant 0 : i32
    return %c0_i32, %c0_i32_0 : i32, i32
  }
  func.func @transform_6(%arg0: i32) -> (i32, i32) {
    %c0_i32 = arith.constant 0 : i32
    %c0_i32_0 = arith.constant 0 : i32
    %c0_i32_1 = arith.constant 0 : i32
    return %c0_i32, %c0_i32_0 : i32, i32
  }
  func.func @transform_7(%arg0: i32) -> (i32, i32, i32, i32) {
    %c0_i32 = arith.constant 0 : i32
    %c0_i32_0 = arith.constant 0 : i32
    %c0_i32_1 = arith.constant 0 : i32
    %c0_i32_2 = arith.constant 0 : i32
    return %arg0, %c0_i32, %c0_i32_0, %c0_i32_1 : i32, i32, i32, i32
  }
}

</mosaic_0001>

<bundles_post_ra>
// kernel: tpu_custom_call.1
= control target key start
LH: loop header
LB: loop body
LE: loop exit
PB: predicated region body
PF: predicated region fallthrough
CT: control target
= control target key end

     0   :  { %12 = vsyncpa [#allocation4], 0  ;;  %s3444_s0 = inlined_call_operand.hbm [shape: bf16[2,8,8,128], index: 0, kind: input, shape index: {}]   ;;  %s3445_s1 = inlined_call_operand.hbm [shape: bf16[128,256], index: 1, kind: input, shape index: {}]   ;;  %s3446_s2 = inlined_call_operand.vmem [shape: f32[1,256], index: 2, kind: input, shape index: {}]   ;;  %s3447_s3 = inlined_call_operand.hbm [shape: f32[3,3,256], index: 3, kind: input, shape index: {}]   ;;  %s3448_s4 = inlined_call_operand.vmem [shape: f32[1,256], index: 4, kind: input, shape index: {}]   ;;  %s3449_s5 = inlined_call_operand.hbm [shape: bf16[256,128], index: 5, kind: input, shape index: {}]   ;;  %s3450_s6 = inlined_call_operand.vmem [shape: f32[1,128], index: 6, kind: input, shape index: {}]   ;;  %s3451_s7 = inlined_call_operand.hbm [shape: f32[2,8,8,128], index: 7, kind: output, shape index: {}]  }
   0x1   :  { %13 = vsyncpa [#allocation7], 0 }
   0x2   :  { %14 = vsyncpa [#allocation10], 0 }
   0x3   :  { %15 = vsyncpa [#allocation5], 0  ;;  %s2273_s24 = smov [#allocation6]  }
   0x4   :  { %s33_s25 = sshll.u32 %s2273_s24, 4  ;;  %s34_s25 = int_to_ptr.vmem [resolvable:$true] %s33_s25 }
   0x5   :  { %s2173_s26 = scalar_lea.vmem %s34_s25, 2048  ;;  %p2178_p1 = scmp.lt.s32.totalorder %s34_s25, %s34_s25 }
   0x6   :  { %p2174_p0 = scmp.ne.s32.totalorder %s34_s25, %s2173_s26  ;;  %p2179_p2 = scmp.lt.s32.totalorder %s2173_s26, %s2173_s26 }
   0x8   :  { %p2180_p3 = por %p2179_p2, %p2178_p1 }
   0xa   :  { %p2181_p4 = pnand %p2180_p3, %p2174_p0 }
   0xc   :  { %2184 = shalt.err (!%p2181_p4)
}
   0xd   :  { %s2274_s27 = smov 128   ;;  %s2275_s28 = smov 8  }
   0xe   :  { %39 = dma.hbm_to_vmem [thread:$0]  %s3445_s1, 2048, %s34_s25, [#allocation7], %s2274_s27, %s2274_s27, %s2275_s28  }
   0xf   :  { %s2276_s8 = smov [#allocation3]  }
  0x10   :  { %s21_s9 = sshll.u32 %s2276_s8, 4  ;;  %s22_s9 = int_to_ptr.vmem [resolvable:$true] %s21_s9 }
  0x11   :  { %s2193_s10 = scalar_lea.vmem %s22_s9, 1024  ;;  %p2198_p6 = scmp.lt.s32.totalorder %s22_s9, %s22_s9 }
  0x12   :  { %p2194_p5 = scmp.ne.s32.totalorder %s22_s9, %s2193_s10  ;;  %p2199_p7 = scmp.lt.s32.totalorder %s2193_s10, %s2193_s10 }
  0x14   :  { %p2200_p8 = por %p2199_p7, %p2198_p6 }
  0x16   :  { %p2201_p9 = pnand %p2200_p8, %p2194_p5 }
  0x18   :  { %2204 = shalt.err (!%p2201_p9)
}
  0x19   :  { %s2277_s11 = smov 64   ;;  %s2278_s12 = smov 4  }
  0x1a   :  { %27 = dma.hbm_to_vmem [thread:$0]  %s3444_s0, 1024, %s22_s9, [#allocation4], %s2277_s11, %s2277_s11, %s2278_s12  }
  0x1b   :  { %s2279_s15 = smov [#allocation8]   ;;  %s2280_s17 = smov [#allocation9]  }
  0x1c   :  { %s47_s16 = sshll.u32 %s2279_s15, 4  ;;  %s61_s1 = sshll.u32 %s2280_s17, 4  ;;  %s48_s16 = int_to_ptr.vmem [resolvable:$true] %s47_s16  ;;  %s62_s1 = int_to_ptr.vmem [resolvable:$true] %s61_s1 }
  0x1d   :  { %s2213_s18 = scalar_lea.vmem %s48_s16, 384  ;;  %p2218_p11 = scmp.lt.s32.totalorder %s48_s16, %s48_s16 }
  0x1e   :  { %p2214_p10 = scmp.ne.s32.totalorder %s48_s16, %s2213_s18  ;;  %p2219_p12 = scmp.lt.s32.totalorder %s2213_s18, %s2213_s18 }
  0x20   :  { %p2220_p13 = por %p2219_p12, %p2218_p11 }
  0x22   :  { %p2221_p0 = pnand %p2220_p13, %p2214_p10 }
  0x24   :  { %2224 = shalt.err (!%p2221_p0)
}
  0x25   :  { %53 = dma.hbm_to_vmem [thread:$0]  %s3447_s3, 384, %s48_s16, [#allocation7], %s2274_s27, %s2274_s27, %s2275_s28  }
  0x26   :  { %s2233_s0 = scalar_lea.vmem %s62_s1, 2048  ;;  %p2238_p2 = scmp.lt.s32.totalorder %s62_s1, %s62_s1 }
  0x27   :  { %p2234_p1 = scmp.ne.s32.totalorder %s62_s1, %s2233_s0  ;;  %p2239_p3 = scmp.lt.s32.totalorder %s2233_s0, %s2233_s0 }
  0x29   :  { %p2240_p4 = por %p2239_p3, %p2238_p2 }
  0x2b   :  { %p2241_p5 = pnand %p2240_p4, %p2234_p1 }
  0x2d   :  { %2244 = shalt.err (!%p2241_p5)
}
  0x2e   :  { %67 = dma.hbm_to_vmem [thread:$0]  %s3449_s5, 2048, %s62_s1, [#allocation10], %s2277_s11, %s2277_s11, %s2278_s12  }
  0x2f   :  { %2265 = dma.done.wait [#allocation4], 1024  }
  0x30   :  { %2266 = vsyncadd [#allocation4], 4294966272 }
  0x31   :  { %2267 = dma.done.wait [#allocation7], 2432  }
  0x32   :  { %2268 = vsyncadd [#allocation7], 4294964864 }
  0x33   :  { %2269 = dma.done.wait [#allocation10], 2048  }
  0x34   :  { %2270 = vsyncadd [#allocation10], 4294965248  ;;  %v2281_v0 = vmov 0   ;;  %v2053_v1 = vld [vmem:[#allocation6 + $0x74] ss:$8 sps:$4 sm:$0xff]   ;;  %v2077_v17 = vld [vmem:[#allocation3] sm:$0xff]   ;;  %v117_v41 = vlaneseq }
  0x35   :  { %287 = vmatprep.mubr.bf16.mxu0 %v2281_v0  ;;  %v2055_v2 = vld [vmem:[#allocation6 + $0x70] ss:$8 sps:$4 sm:$0xff]   ;;  %255 = vmatprep.subr.bf16.mxu0 %v2053_v1  ;;  %v2056_v3 = vld [vmem:[#allocation6 + $0x64] ss:$8 sps:$4 sm:$0xff]   ;;  %v2058_v4 = vld [vmem:[#allocation6 + $0x60] ss:$8 sps:$4 sm:$0xff]  }
  0x36   :  { %256 = vmatpush1.bf16.msra.mxu0 %v2055_v2  ;;  %v2059_v5 = vld [vmem:[#allocation6 + $0x54] ss:$8 sps:$4 sm:$0xff]   ;;  %v2061_v6 = vld [vmem:[#allocation6 + $0x50] ss:$8 sps:$4 sm:$0xff]   ;;  %v2062_v7 = vld [vmem:[#allocation6 + $0x44] ss:$8 sps:$4 sm:$0xff]  }
  0x37   :  { %257 = vmatprep.subr.bf16.mxu0 %v2056_v3  ;;  %v2064_v8 = vld [vmem:[#allocation6 + $0x40] ss:$8 sps:$4 sm:$0xff]   ;;  %v2065_v9 = vld [vmem:[#allocation6 + $0x34] ss:$8 sps:$4 sm:$0xff]   ;;  %v2067_v10 = vld [vmem:[#allocation6 + $0x30] ss:$8 sps:$4 sm:$0xff]  }
  0x38   :  { %v2068_v11 = vld [vmem:[#allocation6 + $0x24] ss:$8 sps:$4 sm:$0xff]   ;;  %v2070_v12 = vld [vmem:[#allocation6 + $0x20] ss:$8 sps:$4 sm:$0xff]   ;;  %v2071_v13 = vld [vmem:[#allocation6 + $0x14] ss:$8 sps:$4 sm:$0xff]  }
  0x39   :  { %v2073_v14 = vld [vmem:[#allocation6 + $0x10] ss:$8 sps:$4 sm:$0xff]   ;;  %v2074_v15 = vld [vmem:[#allocation6 + $0x4] ss:$8 sps:$4 sm:$0xff]   ;;  %v2076_v16 = vld [vmem:[#allocation6] ss:$8 sps:$4 sm:$0xff]  }
  0x3a   :  { %258 = vmatpush1.bf16.msra.mxu0 %v2058_v4  ;;  %v2078_v18 = vld [vmem:[#allocation3 + $0x8] sm:$0xff]   ;;  %v2079_v19 = vld [vmem:[#allocation3 + $0x10] sm:$0xff]   ;;  %v2080_v20 = vld [vmem:[#allocation3 + $0x18] sm:$0xff]   ;;  %v2341_v42 = vshrl.u32 %v117_v41, 7 }
  0x3b   :  { %259 = vmatprep.subr.bf16.mxu0 %v2059_v5  ;;  %v2081_v21 = vld [vmem:[#allocation3 + $0x20] sm:$0xff]   ;;  %v2082_v22 = vld [vmem:[#allocation3 + $0x28] sm:$0xff]   ;;  %v2083_v23 = vld [vmem:[#allocation3 + $0x30] sm:$0xff]  }
  0x3c   :  { %v2084_v24 = vld [vmem:[#allocation3 + $0x38] sm:$0xff]   ;;  %v2085_v25 = vld [vmem:[#allocation9 + $0x78] sm:$0xff]   ;;  %v2087_v27 = vld [vmem:[#allocation9 + $0x70] sm:$0xff]   ;;  %v123_v43 = vsub.s32 1, %v2341_v42  ;;  %v119_v44 = vsub.s32 0, %v2341_v42  ;;  %v518_v47 = vsub.s32 5, %v2341_v42 }
  0x3d   :  { %v2086_v26 = vld [vmem:[#allocation9 + $0x38] sm:$0xff]   ;;  %1979 = vmatprep.subr.bf16.mxu1 %v2085_v25  ;;  %v2088_v28 = vld [vmem:[#allocation9 + $0x30] sm:$0xff]   ;;  %v2089_v29 = vld [vmem:[#allocation9 + $0x68] sm:$0xff]   ;;  %v777_v48 = vsub.s32 4, %v2341_v42  ;;  %v987_v52 = vsub.s32 2, %v2341_v42  ;;  %v991_v54 = vsub.s32 6, %v2341_v42 }
  0x3e   :  { %260 = vmatpush1.bf16.msra.mxu0 %v2061_v6  ;;  %1980 = vmatpush3.bf16.msra.mxu1 %v2086_v26  ;;  %v2090_v30 = vld [vmem:[#allocation9 + $0x28] sm:$0xff]   ;;  %v2091_v31 = vld [vmem:[#allocation9 + $0x60] sm:$0xff]   ;;  %v2093_v33 = vld [vmem:[#allocation9 + $0x58] sm:$0xff]   ;;  %vm1201_vm0 = vcmp.gt.s32.totalorder %v2341_v42, 0  ;;  %vm1268_vm1 = vcmp.lt.s32.totalorder %v2341_v42, 7 }
  0x3f   :  { %261 = vmatprep.subr.bf16.mxu0 %v2062_v7  ;;  %1981 = vmatprep.subr.bf16.mxu1 %v2087_v27  ;;  %v2092_v32 = vld [vmem:[#allocation9 + $0x20] sm:$0xff]   ;;  %v2094_v34 = vld [vmem:[#allocation9 + $0x18] sm:$0xff]   ;;  %v2095_v35 = vld [vmem:[#allocation9 + $0x50] sm:$0xff]  }
  0x40   :  { %v2096_v36 = vld [vmem:[#allocation9 + $0x10] sm:$0xff]   ;;  %v2097_v37 = vld [vmem:[#allocation9 + $0x48] sm:$0xff]   ;;  %v2099_v39 = vld [vmem:[#allocation9 + $0x40] sm:$0xff]  }
  0x41   :  { %v2098_v38 = vld [vmem:[#allocation9 + $0x8] sm:$0xff]   ;;  %v2100_v40 = vld [vmem:[#allocation9] sm:$0xff]   ;;  %v411_v46 = vld [vmem:[#allocation8 + $0x8] sm:$0x77] }
  0x42   :  { %262 = vmatpush1.bf16.msra.mxu0 %v2064_v8  ;;  %1982 = vmatpush3.bf16.msra.mxu1 %v2088_v28  ;;  %v410_v45 = vld [vmem:[#allocation8] sm:$0x77]  ;;  %v566_v51 = vrot.slane %v411_v46, %v123_v43  ;;  %v824_v57 = vrot.slane %v411_v46, %v119_v44  ;;  %v412_v58 = vld [vmem:[#allocation8 + $0x10] sm:$0x77]  ;;  %v1038_v63 = vrot.slane %v411_v46, %v987_v52 }
  0x43   :  { %263 = vmatprep.subr.bf16.mxu0 %v2065_v9  ;;  %1983 = vmatprep.subr.bf16.mxu1 %v2089_v29  ;;  %v99_v49 = vld [vmem:[%s3446_s2] sm:$0x3]  ;;  %v515_v50 = vrot.slane %v410_v45, %v123_v43  ;;  %v774_v53 = vrot.slane %v410_v45, %v119_v44  ;;  %v519_v55 = vrot.slane %v410_v45, %v518_v47 }
  0x44   :  { %v2352_v56 = vrot.slane %v99_v49, %v119_v44  ;;  %v778_v59 = vrot.slane %v410_v45, %v777_v48  ;;  %v2356_v61 = vrot.slane %v566_v51, %v123_v43  ;;  %v988_v62 = vrot.slane %v410_v45, %v987_v52 }
  0x45   :  { %v2354_v60 = vrot.slane %v515_v50, %v123_v43  ;;  %v570_v1 = vrot.slane %v411_v46, %v518_v47  ;;  %v828_v2 = vrot.slane %v411_v46, %v777_v48  ;;  %v992_v3 = vrot.slane %v410_v45, %v991_v54 }
  0x46   :  { %264 = vmatpush1.bf16.msra.mxu0 %v2067_v10  ;;  %1984 = vmatpush3.bf16.msra.mxu1 %v2090_v30  ;;  %v649_v4 = vrot.slane %v412_v58, %v123_v43  ;;  %v906_v5 = vrot.slane %v412_v58, %v119_v44  ;;  %v1042_v6 = vrot.slane %v411_v46, %v991_v54 }
  0x47   :  { %265 = vmatprep.subr.bf16.mxu0 %v2068_v11  ;;  %1985 = vmatprep.subr.bf16.mxu1 %v2091_v31  ;;  %v2360_v7 = vrot.slane %v519_v55, %v123_v43  ;;  %v2362_v8 = vrot.slane %v824_v57, %v119_v44  ;;  %v653_v9 = vrot.slane %v412_v58, %v518_v47  ;;  %v2398_v29 = vmul.f32 0.0, %v2354_v60 }
  0x48   :  { %v910_v10 = vrot.slane %v412_v58, %v777_v48  ;;  %v2364_v11 = vrot.slane %v778_v59, %v119_v44 }
  0x49   :  { %v2390_v26 = vrot.slane %v653_v9, %v123_v43  ;;  %3480 = vst [vmem:[#allocation18_spill] sm:$0xff] %v2398_v29 }
  0x4a   :  { %266 = vmatpush1.bf16.msra.mxu0 %v2070_v12  ;;  %1986 = vmatpush3.bf16.msra.mxu1 %v2092_v32  ;;  %v2366_v12 = vrot.slane %v988_v62, %v987_v52  ;;  %v2392_v27 = vrot.slane %v910_v10, %v119_v44  ;;  %v2395_v28 = vmul.f32 0.0, %v2364_v11 }
  0x4b   :  { %267 = vmatprep.subr.bf16.mxu0 %v2071_v13  ;;  %1987 = vmatprep.subr.bf16.mxu1 %v2093_v33  ;;  %v2368_v13 = vrot.slane %v1038_v63, %v987_v52 }
  0x4c   :  { %3479 = vst [vmem:[#allocation17_spill] sm:$0xff] %v2395_v28  ;;  %v2423_v41 = vmul.f32 0.0, %v2392_v27 }
  0x4e   :  { %268 = vmatpush1.bf16.msra.mxu0 %v2073_v14  ;;  %1988 = vmatpush3.bf16.msra.mxu1 %v2094_v34  ;;  %v2370_v14 = vrot.slane %v99_v49, %v123_v43  ;;  %3485 = vst [vmem:[#allocation23_spill] sm:$0xff] %v2423_v41 }
  0x4f   :  { %269 = vmatprep.subr.bf16.mxu0 %v2074_v15  ;;  %1989 = vmatprep.subr.bf16.mxu1 %v2095_v35  ;;  %v1124_v15 = vrot.slane %v412_v58, %v991_v54 }
  0x51   :  { %v2403_v32 = vrot.slane %v1124_v15, %v987_v52 }
  0x52   :  { %270 = vmatpush1.bf16.msra.mxu0 %v2076_v16  ;;  %1990 = vmatpush3.bf16.msra.mxu1 %v2096_v36  ;;  %v2372_v16 = vrot.slane %v570_v1, %v123_v43 }
  0x53   :  { %1991 = vmatprep.subr.bf16.mxu1 %v2097_v37  ;;  %v2414_v37 = vmul.f32 0.0, %v2366_v12 }
  0x55   :  { %288 = vmatmul.mubr.bf16.vlgmr.msra.gmra.mxu0 %v2077_v17  ;;  %v2374_v17 = vrot.slane %v828_v2, %v119_v44  ;;  %3483 = vst [vmem:[#allocation21_spill] sm:$0xff] %v2414_v37 }
  0x56   :  { %297 = vmatprep.mubr.bf16.mxu0 %v2281_v0  ;;  %1992 = vmatpush3.bf16.msra.mxu1 %v2098_v38 }
  0x57   :  { %1993 = vmatprep.subr.bf16.mxu1 %v2099_v39 }
  0x5a   :  { %1994 = vmatpush3.bf16.msra.mxu1 %v2100_v40  ;;  %v2420_v40 = vmul.f32 0.0, %v2390_v26 }
  0x5c   :  { %3484 = vst [vmem:[#allocation22_spill] sm:$0xff] %v2420_v40 }
  0x5d   :  { %298 = vmatmul.mubr.bf16.gmra.mxu0 %v2078_v18  ;;  %v2376_v18 = vrot.slane %v992_v3, %v987_v52 }
  0x5e   :  { %307 = vmatprep.mubr.bf16.mxu0 %v2281_v0 }
  0x5f   :  { %v2411_v36 = vmul.f32 0.0, %v2376_v18 }
  0x61   :  { %3482 = vst [vmem:[#allocation20_spill] sm:$0xff] %v2411_v36 }
  0x65   :  { %308 = vmatmul.mubr.bf16.gmra.mxu0 %v2079_v19  ;;  %v413_v19 = vld [vmem:[%s3448_s4] sm:$0x3] }
  0x66   :  { %317 = vmatprep.mubr.bf16.mxu0 %v2281_v0  ;;  %v2401_v31 = vrot.slane %v413_v19, %v119_v44  ;;  %v2408_v35 = vrot.slane %v413_v19, %v123_v43 }
  0x6d   :  { %318 = vmatmul.mubr.bf16.gmra.mxu0 %v2080_v20  ;;  %v1120_v20 = vrot.slane %v412_v58, %v987_v52 }
  0x6e   :  { %327 = vmatprep.mubr.bf16.mxu0 %v2281_v0 }
  0x6f   :  { %v2416_v38 = vrot.slane %v1120_v20, %v987_v52 }
  0x71   :  { %v2452_v58 = vmul.f32 0.0, %v2416_v38 }
  0x73   :  { %3489 = vst [vmem:[#allocation27_spill] sm:$0xff] %v2452_v58 }
  0x75   :  { %328 = vmatmul.mubr.bf16.gmra.mxu0 %v2081_v21  ;;  %v2381_v21 = vrot.slane %v649_v4, %v123_v43 }
  0x76   :  { %337 = vmatprep.mubr.bf16.mxu0 %v2281_v0 }
  0x77   :  { %v2431_v47 = vmul.f32 0.0, %v2381_v21 }
  0x79   :  { %3487 = vst [vmem:[#allocation25_spill] sm:$0xff] %v2431_v47 }
  0x7d   :  { %338 = vmatmul.mubr.bf16.gmra.mxu0 %v2082_v22  ;;  %v2383_v22 = vrot.slane %v906_v5, %v119_v44 }
  0x7e   :  { %347 = vmatprep.mubr.bf16.mxu0 %v2281_v0 }
  0x7f   :  { %v2434_v48 = vmul.f32 0.0, %v2383_v22 }
  0x81   :  { %3488 = vst [vmem:[#allocation26_spill] sm:$0xff] %v2434_v48 }
  0x85   :  { %348 = vmatmul.mubr.bf16.gmra.mxu0 %v2083_v23  ;;  %v2385_v23 = vrot.slane %v1042_v6, %v987_v52 }
  0x86   :  { %357 = vmatprep.mubr.bf16.mxu0 %v2281_v0  ;;  %v2358_v0 = vrot.slane %v774_v53, %v119_v44  ;;  %v2426_v44 = vmul.f32 0.0, %v2403_v32 }
  0x88   :  { %v2406_v33 = vmul.f32 0.0, %v2358_v0  ;;  %3486 = vst [vmem:[#allocation24_spill] sm:$0xff] %v2426_v44 }
  0x8a   :  { %3481 = vst [vmem:[#allocation19_spill] sm:$0xff] %v2406_v33 }
  0x8d   :  { %358 = vmatmul.mubr.bf16.gmra.mxu0 %v2084_v24  ;;  %v2388_v24 = vmul.f32 0.0, %v2360_v7 }
  0x8f   :  { %3478 = vst [vmem:[#allocation16_spill] sm:$0xff] %v2388_v24 }
 0x115   :  { %v289_v25 = vpop.f32.mrf.mxu0 }
 0x116   :  { %v290_v30 = vadd.f32 %v289_v25, %v2352_v56 }
 0x117   :  { %v291_v34 = vpop.f32.mrf.mxu0 }
 0x118   :  { %v581_v39 = vmul.f32 %v2356_v61, %v290_v30  ;;  %v532_v43 = vmul.f32 %v2354_v60, %v290_v30  ;;  %v292_v45 = vadd.f32 %v291_v34, %v2370_v14  ;;  %v2437_v49 = vmul.f32 %v2358_v0, %v290_v30 }
 0x119   :  { %v293_v46 = vpop.f32.mrf.mxu0  ;;  %v839_v50 = vmul.f32 %v2362_v8, %v290_v30  ;;  %v2441_v51 = vmul.f32 %v2366_v12, %v290_v30  ;;  %v2444_v52 = vmul.f32 %v2368_v13, %v290_v30 }
 0x11a   :  { %v2447_v53 = vadd.f32 %v293_v46, %v2352_v56  ;;  %v582_v55 = vmul.f32 %v2372_v16, %v292_v45  ;;  %v840_v57 = vmul.f32 %v2374_v17, %v292_v45  ;;  %v533_v62 = vmul.f32 %v2360_v7, %v292_v45 }
 0x11b   :  { %v295_v54 = vpop.f32.mrf.mxu0  ;;  %v1054_v63 = vmul.f32 %v2385_v23, %v292_v45  ;;  %v613_v1 = vadd.f32 %v581_v39, %v2398_v29  ;;  %v792_v4 = vmul.f32 %v2364_v11, %v292_v45  ;;  %v1006_v6 = vmul.f32 %v2376_v18, %v292_v45 }
 0x11c   :  { %v2455_v59 = vadd.f32 %v295_v54, %v2370_v14  ;;  %v614_v3 = vadd.f32 %v582_v55, %v2388_v24  ;;  %v872_v5 = vadd.f32 %v840_v57, %v2395_v28  ;;  %v583_v54 = vmul.f32 %v2356_v61, %v2447_v53 }
 0x11d   :  { %v299_v2 = vpop.f32.mrf.mxu0  ;;  %v1086_v34 = vadd.f32 %v1054_v63, %v2411_v36  ;;  %v664_v55 = vmul.f32 %v2381_v21, %v2447_v53 }
 0x11e   :  { %v2466_v9 = vadd.f32 %v299_v2, %v2352_v56  ;;  %v584_v10 = vmul.f32 %v2372_v16, %v2455_v59  ;;  %v665_v15 = vmul.f32 %v2390_v26, %v2455_v59  ;;  %v842_v19 = vmul.f32 %v2374_v17, %v2455_v59 }
 0x11f   :  { %v301_v20 = vpop.f32.mrf.mxu0  ;;  %v922_v25 = vmul.f32 %v2392_v27, %v2455_v59  ;;  %v1056_v30 = vmul.f32 %v2385_v23, %v2455_v59  ;;  %v1136_v39 = vmul.f32 %v2403_v32, %v2455_v59 }
 0x120   :  { %v2483_v45 = vadd.f32 %v301_v20, %v2370_v14  ;;  %v697_v46 = vadd.f32 %v665_v15, %v614_v3  ;;  %v616_v2 = vadd.f32 %v584_v10, %v533_v62  ;;  %v874_v29 = vadd.f32 %v842_v19, %v792_v4 }
 0x121   :  { %v303_v57 = vpop.f32.mrf.mxu0  ;;  %v954_v28 = vadd.f32 %v922_v25, %v872_v5  ;;  %v1168_v58 = vadd.f32 %v1136_v39, %v1086_v34  ;;  %v1088_v3 = vadd.f32 %v1056_v30, %v1006_v6  ;;  %v666_v62 = vmul.f32 %v2381_v21, %v2466_v9 }
 0x122   :  { %v667_v63 = vmul.f32 %v2390_v26, %v2483_v45  ;;  %v740_v36 = vadd.f32 %v2408_v35, %v697_v46  ;;  %v924_v20 = vmul.f32 %v2392_v27, %v2483_v45  ;;  %v1138_v24 = vmul.f32 %v2403_v32, %v2483_v45 }
 0x123   :  { %v305_v15 = vpop.f32.mrf.mxu0  ;;  %v1203_v48 = vrot.slane %v954_v28, 7  ;;  %v1270_v47 = vrot.slane %v1168_v58, 1  ;;  %v841_v10 = vmul.f32 %v2362_v8, %v2447_v53  ;;  %v871_v19 = vadd.f32 %v839_v50, %v2406_v33 }
 0x124   :  { %v699_v4 = vadd.f32 %v667_v63, %v616_v2  ;;  %v956_v5 = vadd.f32 %v924_v20, %v874_v29  ;;  %v2502_v25 = vadd.f32 %v303_v57, %v2352_v56  ;;  %v1170_v30 = vadd.f32 %v1138_v24, %v1088_v3 }
 0x125   :  { %v309_v6 = vpop.f32.mrf.mxu0  ;;  %v1237_v34 = vsel %vm1201_vm0, %v1203_v48, 0.0  ;;  %v615_v28 = vadd.f32 %v583_v54, %v532_v43  ;;  %v696_v2 = vadd.f32 %v664_v55, %v613_v1  ;;  %v2508_v29 = vadd.f32 %v305_v15, %v2370_v14 }
 0x126   :  { %v742_v58 = vadd.f32 %v2408_v35, %v699_v4  ;;  %v1205_v39 = vrot.slane %v956_v5, 7  ;;  %v1336_v46 = vadd.f32 %v1237_v34, %v740_v36  ;;  %v1272_v20 = vrot.slane %v1170_v30, 1 }
 0x127   :  { %v311_v63 = vpop.f32.mrf.mxu0  ;;  %v1304_v50 = vsel %vm1268_vm1, %v1270_v47, 0.0  ;;  %v698_v57 = vadd.f32 %v666_v62, %v615_v28  ;;  %v2513_v24 = vadd.f32 %v309_v6, %v2352_v56  ;;  %v921_v36 = vmul.f32 %v2383_v22, %v2447_v53 }
 0x128   :  { %v1239_v43 = vsel %vm1201_vm0, %v1205_v39, 0.0  ;;  %v1368_v48 = vadd.f32 %v1336_v46, %v1304_v50  ;;  %v873_v55 = vadd.f32 %v841_v10, %v2437_v49  ;;  %v923_v3 = vmul.f32 %v2383_v22, %v2466_v9 }
 0x129   :  { %v313_v1 = vpop.f32.mrf.mxu0  ;;  %v1338_v54 = vadd.f32 %v1239_v43, %v742_v58  ;;  %v1055_v47 = vmul.f32 %v2368_v13, %v2447_v53  ;;  %v1306_v15 = vsel %vm1268_vm1, %v1272_v20, 0.0  ;;  %v739_v4 = vadd.f32 %v2401_v31, %v696_v2 }
 0x12a   :  { %v1400_v62 = vmul.f32 %v1368_v48, %v1368_v48  ;;  %v953_v5 = vadd.f32 %v921_v36, %v871_v19  ;;  %v741_v34 = vadd.f32 %v2401_v31, %v698_v57  ;;  %v955_v28 = vadd.f32 %v923_v3, %v873_v55 }
 0x12b   :  { %v315_v6 = vpop.f32.mrf.mxu0  ;;  %v1370_v30 = vadd.f32 %v1338_v54, %v1306_v15  ;;  %v1085_v49 = vadd.f32 %v2444_v52, %v2414_v37  ;;  %v1087_v58 = vadd.f32 %v1055_v47, %v2441_v51  ;;  %v1135_v39 = vmul.f32 %v2416_v38, %v2447_v53 }
 0x12c   :  { %v1432_v10 = vmul.f32 0.035677407, %v1400_v62  ;;  %v1137_v46 = vmul.f32 %v2416_v38, %v2466_v9  ;;  %v2536_v2 = vadd.f32 %v311_v63, %v2370_v14  ;;  %v1202_v50 = vrot.slane %v953_v5, 7 }
 0x12d   :  { %v319_v19 = vpop.f32.mrf.mxu0  ;;  %v1402_v20 = vmul.f32 %v1370_v30, %v1370_v30  ;;  %v1204_v57 = vrot.slane %v955_v28, 7  ;;  %v2539_v43 = vadd.f32 %v313_v1, %v2352_v56  ;;  %v1167_v36 = vadd.f32 %v1135_v39, %v1085_v49 }
 0x12e   :  { %v1464_v52 = vadd.f32 0.7978846, %v1432_v10  ;;  %v1169_v54 = vadd.f32 %v1137_v46, %v1087_v58  ;;  %v2541_v3 = vmul.f32 0.5, %v1368_v48  ;;  %v1236_v47 = vsel %vm1201_vm0, %v1202_v50, 0.0 }
 0x12f   :  { %v321_v51 = vpop.f32.mrf.mxu0  ;;  %v1434_v55 = vmul.f32 0.035677407, %v1402_v20  ;;  %v1238_v63 = vsel %vm1201_vm0, %v1204_v57, 0.0  ;;  %v2548_v15 = vadd.f32 %v315_v6, %v2370_v14  ;;  %v1269_v5 = vrot.slane %v1167_v36, 1 }
 0x130   :  { %v1496_v62 = vmul.f32 %v1464_v52, %v1368_v48  ;;  %v1271_v1 = vrot.slane %v1169_v54, 1  ;;  %v2550_v49 = vmul.f32 0.5, %v1370_v30  ;;  %v1335_v58 = vadd.f32 %v1236_v47, %v739_v4 }
 0x131   :  { %v323_v28 = vpop.f32.mrf.mxu0  ;;  %v1466_v10 = vadd.f32 0.7978846, %v1434_v55  ;;  %v1337_v39 = vadd.f32 %v1238_v63, %v741_v34  ;;  %v1303_v20 = vsel %vm1268_vm1, %v1269_v5, 0.0  ;;  %v2560_v48 = vadd.f32 %v319_v19, %v2352_v56 }
 0x132   :  { %v2553_v46 = vadd.f32 %v323_v28, %v2352_v56  ;;  %2101 = vtanh.f32 %v1496_v62  ;;  %v1305_v6 = vsel %vm1268_vm1, %v1271_v1, 0.0  ;;  %v1367_v52 = vadd.f32 %v1335_v58, %v1303_v20 }
 0x133   :  { %v325_v50 = vpop.f32.mrf.mxu0  ;;  %v1498_v57 = vmul.f32 %v1466_v10, %v1370_v30  ;;  %v1369_v36 = vadd.f32 %v1337_v39, %v1305_v6  ;;  %v2563_v4 = vadd.f32 %v321_v51, %v2370_v14  ;;  %v535_v34 = vmul.f32 %v2360_v7, %v2455_v59 }
 0x134   :  { %3490 = vst [vmem:[#allocation28_spill] sm:$0xff] %v2553_v46  ;;  %v537_v54 = vmul.f32 %v2360_v7, %v2483_v45  ;;  %v586_v55 = vmul.f32 %v2372_v16, %v2483_v45  ;;  %v2573_v19 = vmul.f32 %v2356_v61, %v2553_v46  ;;  %v2577_v30 = vmul.f32 %v2381_v21, %v2553_v46 }
 0x135   :  { %v2580_v51 = vadd.f32 %v325_v50, %v2370_v14  ;;  %v329_v47 = vpop.f32.mrf.mxu0  ;;  %2103 = vtanh.f32 %v1498_v57  ;;  %v2584_v63 = vmul.f32 %v2362_v8, %v2553_v46  ;;  %v1399_v5 = vmul.f32 %v1367_v52, %v1367_v52 }
 0x136   :  { %3491 = vst [vmem:[#allocation29_spill] sm:$0xff] %v2573_v19  ;;  %3492 = vst [vmem:[#allocation30_spill] sm:$0xff] %v2577_v30  ;;  %v330_v62 = vadd.f32 %v329_v47, %v2352_v56  ;;  %v1401_v1 = vmul.f32 %v1369_v36, %v1369_v36  ;;  %v2589_v28 = vmul.f32 %v2383_v22, %v2553_v46  ;;  %v2595_v39 = vmul.f32 0.5, %v1367_v52 }
 0x137   :  { %3493 = vst [vmem:[#allocation31_spill] sm:$0xff] %v2580_v51  ;;  %3494 = vst [vmem:[#allocation32_spill] sm:$0xff] %v2584_v63  ;;  %v2593_v10 = vmul.f32 %v2368_v13, %v2553_v46  ;;  %v331_v58 = vpop.f32.mrf.mxu0  ;;  %v2597_v20 = vmul.f32 0.5, %v1369_v36  ;;  %v2601_v6 = vmul.f32 %v2372_v16, %v2580_v51  ;;  %v2605_v50 = vmul.f32 %v2390_v26, %v2580_v51 }
 0x138   :  { %3495 = vst [vmem:[#allocation33_spill] sm:$0xff] %v2589_v28  ;;  %v2609_v57 = vmul.f32 %v2374_v17, %v2580_v51  ;;  %v2613_v47 = vmul.f32 %v2392_v27, %v2580_v51  ;;  %v2617_v37 = vmul.f32 %v2385_v23, %v2580_v51  ;;  %v2620_v33 = vmul.f32 %v2354_v60, %v330_v62 }
 0x139   :  { %3496 = vst [vmem:[#allocation34_spill] sm:$0xff] %v2593_v10  ;;  %3497 = vst [vmem:[#allocation35_spill] sm:$0xff] %v2605_v50  ;;  %v2623_v10 = vmul.f32 %v2356_v61, %v330_v62  ;;  %v332_v46 = vadd.f32 %v331_v58, %v2370_v14  ;;  %v333_v28 = vpop.f32.mrf.mxu0  ;;  %v2627_v63 = vmul.f32 %v2358_v0, %v330_v62  ;;  %v1431_v19 = vmul.f32 0.035677407, %v1399_v5 }
 0x13a   :  { %3498 = vst [vmem:[#allocation36_spill] sm:$0xff] %v2613_v47  ;;  %3499 = vst [vmem:[#allocation37_spill] sm:$0xff] %v2617_v37  ;;  %v2630_v30 = vmul.f32 %v2362_v8, %v330_v62  ;;  %v1433_v44 = vmul.f32 0.035677407, %v1401_v1  ;;  %v2633_v51 = vmul.f32 %v2366_v12, %v330_v62  ;;  %v2636_v37 = vmul.f32 %v2368_v13, %v330_v62 }
 0x13b   :  { %3500 = vst [vmem:[#allocation38_spill] sm:$0xff] %v2620_v33  ;;  %3501 = vst [vmem:[#allocation39_spill] sm:$0xff] %v2623_v10  ;;  %v2639_v33 = vadd.f32 %v333_v28, %v2352_v56  ;;  %v335_v10 = vpop.f32.mrf.mxu0  ;;  %v588_v58 = vmul.f32 %v2372_v16, %v2508_v29  ;;  %v2650_v5 = vmul.f32 %v2364_v11, %v332_v46  ;;  %v1463_v1 = vadd.f32 0.7978846, %v1431_v19 }
 0x13c   :  { %3502 = vst [vmem:[#allocation40_spill] sm:$0xff] %v2627_v63  ;;  %3503 = vst [vmem:[#allocation41_spill] sm:$0xff] %v2630_v30  ;;  %v2644_v63 = vmul.f32 %v2360_v7, %v332_v46  ;;  %v2647_v30 = vmul.f32 %v2372_v16, %v332_v46  ;;  %v2653_v62 = vmul.f32 %v2374_v17, %v332_v46  ;;  %v1465_v28 = vadd.f32 0.7978846, %v1433_v44 }
 0x13d   :  { %3504 = vst [vmem:[#allocation42_spill] sm:$0xff] %v2633_v51  ;;  %3505 = vst [vmem:[#allocation43_spill] sm:$0xff] %v2636_v37  ;;  %v339_v51 = vpop.f32.mrf.mxu0  ;;  %v618_v37 = vadd.f32 %v586_v55, %v535_v34  ;;  %v2658_v47 = vmul.f32 %v2376_v18, %v332_v46  ;;  %v2666_v41 = vadd.f32 %v335_v10, %v2370_v14 }
 0x13e   :  { %3506 = vst [vmem:[#allocation44_spill] sm:$0xff] %v2639_v33  ;;  %3507 = vst [vmem:[#allocation45_spill] sm:$0xff] %v2644_v63  ;;  %v669_v33 = vmul.f32 %v2390_v26, %v2508_v29  ;;  %v2661_v63 = vmul.f32 %v2385_v23, %v332_v46  ;;  %v1497_v44 = vmul.f32 %v1465_v28, %v1369_v36 }
 0x13f   :  { %3508 = vst [vmem:[#allocation46_spill] sm:$0xff] %v2647_v30  ;;  %3509 = vst [vmem:[#allocation47_spill] sm:$0xff] %v2650_v5  ;;  %v1495_v30 = vmul.f32 %v1463_v1, %v1367_v52  ;;  %v671_v5 = vmul.f32 %v2390_v26, %v2536_v2  ;;  %v2102_v19 = vpop.eup %2101  ;;  %v844_v55 = vmul.f32 %v2374_v17, %v2483_v45 }
 0x140   :  { %3510 = vst [vmem:[#allocation48_spill] sm:$0xff] %v2653_v62  ;;  %3511 = vst [vmem:[#allocation49_spill] sm:$0xff] %v2658_v47  ;;  %v341_v62 = vpop.f32.mrf.mxu0  ;;  %v701_v34 = vadd.f32 %v669_v33, %v618_v37  ;;  %v1592_v40 = vadd.f32 1.0, %v2102_v19  ;;  %v620_v47 = vadd.f32 %v588_v58, %v537_v54  ;;  %v794_v46 = vmul.f32 %v2364_v11, %v2455_v59 }
 0x141   :  { %3512 = vst [vmem:[#allocation50_spill] sm:$0xff] %v2661_v63  ;;  %3513 = vst [vmem:[#allocation51_spill] sm:$0xff] %v2666_v41  ;;  %2105 = vtanh.f32 %v1495_v30  ;;  %v2673_v52 = vadd.f32 %v339_v51, %v2352_v56  ;;  %v796_v10 = vmul.f32 %v2364_v11, %v2483_v45  ;;  %v846_v33 = vmul.f32 %v2374_v17, %v2508_v29 }
 0x142   :  { %v343_v1 = vpop.f32.mrf.mxu0  ;;  %2107 = vtanh.f32 %v1497_v44  ;;  %v2104_v37 = vpop.eup %2103  ;;  %v703_v36 = vadd.f32 %v671_v5, %v620_v47  ;;  %v744_v28 = vadd.f32 %v2408_v35, %v701_v34  ;;  %v876_v30 = vadd.f32 %v844_v55, %v794_v46 }
 0x143   :  { %3514 = vst [vmem:[#allocation52_spill] sm:$0xff] %v2673_v52  ;;  %v926_v54 = vmul.f32 %v2392_v27, %v2508_v29  ;;  %v1594_v19 = vadd.f32 1.0, %v2104_v37  ;;  %v1624_v51 = vmul.f32 %v1592_v40, %v2541_v3  ;;  %v878_v52 = vadd.f32 %v846_v33, %v796_v10 }
 0x144   :  { %v345_v58 = vpop.f32.mrf.mxu0  ;;  %v928_v44 = vmul.f32 %v2392_v27, %v2536_v2  ;;  %v1008_v41 = vmul.f32 %v2376_v18, %v2455_v59  ;;  %v1010_v47 = vmul.f32 %v2376_v18, %v2483_v45  ;;  %v1058_v5 = vmul.f32 %v2385_v23, %v2483_v45 }
 0x145   :  { %v958_v63 = vadd.f32 %v926_v54, %v876_v30  ;;  %v1626_v55 = vmul.f32 %v1594_v19, %v2550_v49  ;;  %v1060_v40 = vmul.f32 %v2385_v23, %v2508_v29  ;;  %v1140_v3 = vmul.f32 %v2403_v32, %v2508_v29 }
 0x146   :  { %v349_v34 = vpop.f32.mrf.mxu0  ;;  %v960_v46 = vadd.f32 %v928_v44, %v878_v52  ;;  %v746_v10 = vadd.f32 %v2408_v35, %v703_v36  ;;  %v1090_v33 = vadd.f32 %v1058_v5, %v1008_v41  ;;  %v1142_v59 = vmul.f32 %v2403_v32, %v2536_v2 }
 0x147   :  { %v1207_v37 = vrot.slane %v958_v63, 7  ;;  %v2700_v30 = vadd.f32 %v341_v62, %v2370_v14  ;;  %v1656_v54 = vpack.c.bf16 %v1626_v55, %v1624_v51  ;;  %v1092_v49 = vadd.f32 %v1060_v40, %v1010_v47 }
 0x148   :  { %v351_v45 = vpop.f32.mrf.mxu0  ;;  %v1209_v52 = vrot.slane %v960_v46, 7  ;;  %v2703_v19 = vadd.f32 %v343_v1, %v2352_v56  ;;  %v2706_v44 = vadd.f32 %v345_v58, %v2370_v14  ;;  %v1172_v50 = vadd.f32 %v1140_v3, %v1090_v33 }
 0x149   :  { %v1241_v41 = vsel %vm1201_vm0, %v1207_v37, 0.0  ;;  %1838 = vmatprep.mubr.bf16.mxu1 %v1656_v54  ;;  %v1174_v63 = vadd.f32 %v1142_v59, %v1092_v49  ;;  %v585_v51 = vmul.f32 %v2356_v61, %v2466_v9  ;;  %v2715_v1 = vadd.f32 %v349_v34, %v2352_v56 }
 0x14a   :  { %3515 = vst [vmem:[#allocation53_spill] sm:$0xff] %v2703_v19  ;;  %3516 = vst [vmem:[#allocation54_spill] sm:$0xff] %v2706_v44  ;;  %v353_v36 = vpop.f32.mrf.mxu0  ;;  %v1243_v62 = vsel %vm1201_vm0, %v1209_v52, 0.0  ;;  %v1340_v5 = vadd.f32 %v1241_v41, %v744_v28  ;;  %v1274_v47 = vrot.slane %v1172_v50, 1  ;;  %v587_v55 = vmul.f32 %v2356_v61, %v2502_v25 }
 0x14b   :  { %3517 = vst [vmem:[#allocation55_spill] sm:$0xff] %v2715_v1  ;;  %v1342_v58 = vadd.f32 %v1243_v62, %v746_v10  ;;  %v2720_v46 = vadd.f32 %v351_v45, %v2370_v14  ;;  %v1276_v3 = vrot.slane %v1174_v63, 1  ;;  %v534_v33 = vmul.f32 %v2354_v60, %v2447_v53 }
 0x14c   :  { %v355_v40 = vpop.f32.mrf.mxu0  ;;  %v668_v28 = vmul.f32 %v2381_v21, %v2502_v25  ;;  %v2727_v59 = vadd.f32 %v353_v36, %v2352_v56  ;;  %v1308_v50 = vsel %vm1268_vm1, %v1274_v47, 0.0  ;;  %v536_v34 = vmul.f32 %v2354_v60, %v2466_v9 }
 0x14d   :  { %3518 = vst [vmem:[#allocation56_spill] sm:$0xff] %v2720_v46  ;;  %v670_v10 = vmul.f32 %v2381_v21, %v2513_v24  ;;  %v2736_v45 = vadd.f32 %v355_v40, %v2370_v14  ;;  %v1310_v49 = vsel %vm1268_vm1, %v1276_v3, 0.0  ;;  %v1372_v52 = vadd.f32 %v1340_v5, %v1308_v50 }
 0x14e   :  { %3519 = vst [vmem:[#allocation57_spill] sm:$0xff] %v2727_v59  ;;  %v2106_v37 = vpop.eup %2105  ;;  %v359_v54 = vpop.f32.mrf.mxu0  ;;  %v617_v41 = vadd.f32 %v585_v51, %v534_v33  ;;  %v1374_v62 = vadd.f32 %v1342_v58, %v1310_v49  ;;  %v619_v47 = vadd.f32 %v587_v55, %v536_v34  ;;  %v793_v59 = vmul.f32 %v2358_v0, %v2447_v53 }
 0x14f   :  { %3520 = vst [vmem:[#allocation58_spill] sm:$0xff] %v2736_v45  ;;  %v2108_v36 = vpop.eup %2107  ;;  %v1591_v63 = vadd.f32 1.0, %v2106_v37  ;;  %v1404_v46 = vmul.f32 %v1372_v52, %v1372_v52  ;;  %v795_v40 = vmul.f32 %v2358_v0, %v2466_v9  ;;  %v2745_v45 = vadd.f32 %v359_v54, %v2352_v56 }
 0x150   :  { %v1593_v1 = vadd.f32 1.0, %v2108_v36  ;;  %v361_v19 = vpop.f32.mrf.mxu0  ;;  %v700_v44 = vadd.f32 %v668_v28, %v617_v41  ;;  %v1406_v3 = vmul.f32 %v1374_v62, %v1374_v62  ;;  %v2747_v5 = vmul.f32 0.5, %v1372_v52 }
 0x151   :  { %v702_v51 = vadd.f32 %v670_v10, %v619_v47  ;;  %v1623_v58 = vmul.f32 %v1591_v63, %v2595_v39  ;;  %v1436_v50 = vmul.f32 0.035677407, %v1404_v46  ;;  %v843_v34 = vmul.f32 %v2362_v8, %v2466_v9 }
 0x152   :  { %v1625_v55 = vmul.f32 %v1593_v1, %v2597_v20  ;;  %v363_v33 = vpop.f32.mrf.mxu0  ;;  %v1438_v37 = vmul.f32 0.035677407, %v1406_v3  ;;  %v845_v54 = vmul.f32 %v2362_v8, %v2502_v25  ;;  %v925_v49 = vmul.f32 %v2383_v22, %v2502_v25 }
 0x153   :  { %v2754_v28 = vadd.f32 %v363_v33, %v2352_v56  ;;  %v1468_v41 = vadd.f32 0.7978846, %v1436_v50  ;;  %v743_v39 = vadd.f32 %v2401_v31, %v700_v44  ;;  %v927_v20 = vmul.f32 %v2383_v22, %v2513_v24 }
 0x154   :  { %v1655_v10 = vpack.c.bf16 %v1625_v55, %v1623_v58  ;;  %v2764_v1 = vadd.f32 %v361_v19, %v2370_v14  ;;  %v2766_v46 = vmul.f32 0.5, %v1374_v62  ;;  %v745_v56 = vadd.f32 %v2401_v31, %v702_v51  ;;  %v365_v51 = vpop.f32.mrf.mxu0 }
 0x155   :  { %3521 = vst [vmem:[#allocation59_spill] sm:$0xff] %v2754_v28  ;;  %v875_v36 = vadd.f32 %v843_v34, %v793_v59  ;;  %v2771_v63 = vmul.f32 %v2356_v61, %v2754_v28  ;;  %v1470_v47 = vadd.f32 0.7978846, %v1438_v37  ;;  %v1500_v3 = vmul.f32 %v1468_v41, %v1372_v52 }
 0x156   :  { %1839 = vmatmul.mubr.bf16.vlgmr.msra.gmra.mxu1 %v1655_v10  ;;  %v877_v58 = vadd.f32 %v845_v54, %v795_v40  ;;  %v1007_v55 = vmul.f32 %v2366_v12, %v2447_v53  ;;  %v1009_v19 = vmul.f32 %v2366_v12, %v2466_v9  ;;  %v1057_v33 = vmul.f32 %v2368_v13, %v2466_v9 }
 0x157   :  { %3522 = vst [vmem:[#allocation60_spill] sm:$0xff] %v2771_v63  ;;  %v957_v44 = vadd.f32 %v925_v49, %v875_v36  ;;  %v1502_v59 = vmul.f32 %v1470_v47, %v1374_v62  ;;  %2109 = vtanh.f32 %v1500_v3  ;;  %v1059_v34 = vmul.f32 %v2368_v13, %v2502_v25 }
 0x158   :  { %v959_v50 = vadd.f32 %v927_v20, %v877_v58  ;;  %v1089_v37 = vadd.f32 %v1057_v33, %v1007_v55  ;;  %v1139_v52 = vmul.f32 %v2416_v38, %v2502_v25  ;;  %v1141_v53 = vmul.f32 %v2416_v38, %v2513_v24 }
 0x159   :  { %v1206_v40 = vrot.slane %v957_v44, 7  ;;  %2111 = vtanh.f32 %v1502_v59  ;;  %v1091_v54 = vadd.f32 %v1059_v34, %v1009_v19  ;;  %v2786_v9 = vadd.f32 %v365_v51, %v2370_v14 }
 0x15a   :  { %v1208_v49 = vrot.slane %v959_v50, 7  ;;  %v2790_v62 = vmul.f32 %v2381_v21, %v2754_v28  ;;  %v2794_v10 = vmul.f32 %v2362_v8, %v2754_v28  ;;  %v1171_v41 = vadd.f32 %v1139_v52, %v1089_v37 }
 0x15b   :  { %3523 = vst [vmem:[#allocation61_spill] sm:$0xff] %v2786_v9  ;;  %v1240_v20 = vsel %vm1201_vm0, %v1206_v40, 0.0  ;;  %v1173_v36 = vadd.f32 %v1141_v53, %v1091_v54  ;;  %v539_v14 = vmul.f32 %v2360_v7, %v2508_v29  ;;  %v2804_v55 = vmul.f32 %v2372_v16, %v2786_v9 }
 0x15c   :  { %3524 = vst [vmem:[#allocation62_spill] sm:$0xff] %v2790_v62  ;;  %3525 = vst [vmem:[#allocation63_spill] sm:$0xff] %v2794_v10  ;;  %v1242_v47 = vsel %vm1201_vm0, %v1208_v49, 0.0  ;;  %v1339_v3 = vadd.f32 %v1240_v20, %v743_v39  ;;  %v1273_v58 = vrot.slane %v1171_v41, 1  ;;  %v541_v19 = vmul.f32 %v2360_v7, %v2536_v2 }
 0x15d   :  { %v1341_v44 = vadd.f32 %v1242_v47, %v745_v56  ;;  %v1275_v33 = vrot.slane %v1173_v36, 1  ;;  %v2810_v51 = vmul.f32 %v2390_v26, %v2786_v9  ;;  %v2814_v39 = vmul.f32 %v2374_v17, %v2786_v9 }
 0x15e   :  { %v590_v59 = vmul.f32 %v2372_v16, %v2536_v2  ;;  %v1307_v56 = vsel %vm1268_vm1, %v1273_v58, 0.0  ;;  %v592_v50 = vmul.f32 %v2372_v16, %v2548_v15  ;;  %v673_v34 = vmul.f32 %v2390_v26, %v2548_v15 }
 0x15f   :  { %3526 = vst [vmem:[#allocation64_spill] sm:$0xff] %v2810_v51  ;;  %v675_v37 = vmul.f32 %v2390_v26, %v2563_v4  ;;  %v1309_v52 = vsel %vm1268_vm1, %v1275_v33, 0.0  ;;  %v2828_v53 = vadd.f32 %v1339_v3, %v1307_v56  ;;  %v2832_v40 = vmul.f32 %v2392_v27, %v2786_v9 }
 0x160   :  { %v622_v54 = vadd.f32 %v590_v59, %v539_v14  ;;  %v2834_v49 = vadd.f32 %v1341_v44, %v1309_v52  ;;  %v624_v41 = vadd.f32 %v592_v50, %v541_v19  ;;  %v798_v20 = vmul.f32 %v2364_v11, %v2508_v29 }
 0x161   :  { %3527 = vst [vmem:[#allocation65_spill] sm:$0xff] %v2832_v40  ;;  %v848_v36 = vmul.f32 %v2374_v17, %v2536_v2  ;;  %v1403_v47 = vmul.f32 %v2828_v53, %v2828_v53  ;;  %v800_v3 = vmul.f32 %v2364_v11, %v2536_v2  ;;  %v850_v33 = vmul.f32 %v2374_v17, %v2548_v15 }
 0x162   :  { %v705_v58 = vadd.f32 %v673_v34, %v622_v54  ;;  %v1405_v14 = vmul.f32 %v2834_v49, %v2834_v49  ;;  %v2850_v44 = vmul.f32 %v2385_v23, %v2786_v9  ;;  %v707_v19 = vadd.f32 %v675_v37, %v624_v41 }
 0x163   :  { %v880_v59 = vadd.f32 %v848_v36, %v798_v20  ;;  %v1435_v56 = vmul.f32 0.035677407, %v1403_v47  ;;  %v882_v52 = vadd.f32 %v850_v33, %v800_v3  ;;  %v930_v34 = vmul.f32 %v2392_v27, %v2548_v15 }
 0x164   :  { %3528 = vst [vmem:[#allocation66_spill] sm:$0xff] %v2850_v44  ;;  %v748_v50 = vadd.f32 %v2408_v35, %v705_v58  ;;  %v2110_v54 = vpop.eup %2109  ;;  %v1437_v10 = vmul.f32 0.035677407, %v1405_v14  ;;  %v750_v62 = vadd.f32 %v2408_v35, %v707_v19  ;;  %v932_v28 = vmul.f32 %v2392_v27, %v2563_v4 }
 0x165   :  { %v1012_v63 = vmul.f32 %v2376_v18, %v2508_v29  ;;  %v1596_v9 = vadd.f32 1.0, %v2110_v54  ;;  %v1467_v37 = vadd.f32 0.7978846, %v1435_v56  ;;  %v962_v41 = vadd.f32 %v930_v34, %v880_v59 }
 0x166   :  { %v1014_v20 = vmul.f32 %v2376_v18, %v2536_v2  ;;  %v2112_v36 = vpop.eup %2111  ;;  %v1469_v47 = vadd.f32 0.7978846, %v1437_v10  ;;  %v964_v58 = vadd.f32 %v932_v28, %v882_v52  ;;  %v1062_v3 = vmul.f32 %v2385_v23, %v2536_v2 }
 0x167   :  { %v1064_v33 = vmul.f32 %v2385_v23, %v2548_v15  ;;  %v1598_v14 = vadd.f32 1.0, %v2112_v36  ;;  %v1628_v19 = vmul.f32 %v1596_v9, %v2747_v5  ;;  %v1499_v29 = vmul.f32 %v1467_v37, %v2828_v53 }
 0x168   :  { %v1144_v59 = vmul.f32 %v2403_v32, %v2548_v15  ;;  %v1501_v56 = vmul.f32 %v1469_v47, %v2834_v49  ;;  %v1094_v34 = vadd.f32 %v1062_v3, %v1012_v63  ;;  %v1146_v28 = vmul.f32 %v2403_v32, %v2563_v4 }
 0x169   :  { %v1096_v54 = vadd.f32 %v1064_v33, %v1014_v20  ;;  %v1630_v2 = vmul.f32 %v1598_v14, %v2766_v46  ;;  %2113 = vtanh.f32 %v1499_v29  ;;  %v1211_v10 = vrot.slane %v962_v41, 7 }
 0x16a   :  { %v1213_v52 = vrot.slane %v964_v58, 7  ;;  %2115 = vtanh.f32 %v1501_v56  ;;  %v1176_v36 = vadd.f32 %v1144_v59, %v1094_v34  ;;  %v538_v9 = vmul.f32 %v2354_v60, %v2502_v25 }
 0x16b   :  { %v1178_v5 = vadd.f32 %v1146_v28, %v1096_v54  ;;  %v1658_v37 = vpack.c.bf16 %v1630_v2, %v1628_v19  ;;  %v1245_v47 = vsel %vm1201_vm0, %v1211_v10, 0.0  ;;  %v540_v20 = vmul.f32 %v2354_v60, %v2513_v24 }
 0x16c   :  { %v1247_v63 = vsel %vm1201_vm0, %v1213_v52, 0.0  ;;  %v1278_v46 = vrot.slane %v1176_v36, 1  ;;  %v1344_v41 = vadd.f32 %v1245_v47, %v748_v50  ;;  %v589_v33 = vmul.f32 %v2356_v61, %v2513_v24 }
 0x16d   :  { %v1280_v3 = vrot.slane %v1178_v5, 1  ;;  %v1346_v58 = vadd.f32 %v1247_v63, %v750_v62  ;;  %1846 = vmatprep.mubr.bf16.mxu1 %v1658_v37  ;;  %v591_v14 = vmul.f32 %v2356_v61, %v2539_v43  ;;  %v672_v19 = vmul.f32 %v2381_v21, %v2539_v43 }
 0x16e   :  { %v674_v29 = vmul.f32 %v2381_v21, %v2560_v48  ;;  %v1312_v59 = vsel %vm1268_vm1, %v1278_v46, 0.0  ;;  %v797_v62 = vmul.f32 %v2358_v0, %v2502_v25  ;;  %v799_v56 = vmul.f32 %v2358_v0, %v2513_v24 }
 0x16f   :  { %v1314_v50 = vsel %vm1268_vm1, %v1280_v3, 0.0  ;;  %v1376_v34 = vadd.f32 %v1344_v41, %v1312_v59  ;;  %v621_v28 = vadd.f32 %v589_v33, %v538_v9  ;;  %v623_v2 = vadd.f32 %v591_v14, %v540_v20 }
 0x170   :  { %v2898_v54 = vadd.f32 %v1346_v58, %v1314_v50  ;;  %v847_v10 = vmul.f32 %v2362_v8, %v2513_v24  ;;  %v849_v52 = vmul.f32 %v2362_v8, %v2539_v43  ;;  %v929_v36 = vmul.f32 %v2383_v22, %v2539_v43 }
 0x171   :  { %v931_v5 = vmul.f32 %v2383_v22, %v2560_v48  ;;  %v1531_v37 = vmul.f32 0.5, %v2828_v53  ;;  %v1533_v47 = vmul.f32 0.5, %v2834_v49  ;;  %v1408_v63 = vmul.f32 %v1376_v34, %v1376_v34 }
 0x172   :  { %v1410_v9 = vmul.f32 %v2898_v54, %v2898_v54  ;;  %v704_v20 = vadd.f32 %v672_v19, %v621_v28  ;;  %v706_v46 = vadd.f32 %v674_v29, %v623_v2  ;;  %v879_v3 = vadd.f32 %v847_v10, %v797_v62 }
 0x173   :  { %v881_v41 = vadd.f32 %v849_v52, %v799_v56  ;;  %v1440_v58 = vmul.f32 0.035677407, %v1408_v63  ;;  %v1011_v14 = vmul.f32 %v2366_v12, %v2502_v25  ;;  %v1013_v59 = vmul.f32 %v2366_v12, %v2513_v24 }
 0x174   :  { %v1442_v33 = vmul.f32 0.035677407, %v1410_v9  ;;  %v747_v53 = vadd.f32 %v2401_v31, %v704_v20  ;;  %v749_v49 = vadd.f32 %v2401_v31, %v706_v46  ;;  %v961_v50 = vadd.f32 %v929_v36, %v879_v3 }
 0x175   :  { %v963_v40 = vadd.f32 %v931_v5, %v881_v41  ;;  %v1472_v44 = vadd.f32 0.7978846, %v1440_v58  ;;  %v1061_v19 = vmul.f32 %v2368_v13, %v2513_v24  ;;  %v1063_v29 = vmul.f32 %v2368_v13, %v2539_v43 }
 0x176   :  { %v1474_v51 = vadd.f32 0.7978846, %v1442_v33  ;;  %v2114_v62 = vpop.eup %2113  ;;  %v1143_v25 = vmul.f32 %v2416_v38, %v2539_v43  ;;  %v1145_v56 = vmul.f32 %v2416_v38, %v2560_v48  ;;  %v1210_v28 = vrot.slane %v961_v50, 7 }
 0x177   :  { %v1212_v2 = vrot.slane %v963_v40, 7  ;;  %v2116_v10 = vpop.eup %2115  ;;  %v1595_v52 = vadd.f32 1.0, %v2114_v62  ;;  %v1504_v36 = vmul.f32 %v1472_v44, %v1376_v34  ;;  %v1093_v63 = vadd.f32 %v1061_v19, %v1011_v14 }
 0x178   :  { %v1506_v5 = vmul.f32 %v1474_v51, %v2898_v54  ;;  %v1597_v9 = vadd.f32 1.0, %v2116_v10  ;;  %v1095_v24 = vadd.f32 %v1063_v29, %v1013_v59  ;;  %v1244_v20 = vsel %vm1201_vm0, %v1210_v28, 0.0 }
 0x179   :  { %v1246_v46 = vsel %vm1201_vm0, %v1212_v2, 0.0  ;;  %v1627_v3 = vmul.f32 %v1595_v52, %v1531_v37  ;;  %2117 = vtanh.f32 %v1504_v36  ;;  %v1175_v41 = vadd.f32 %v1143_v25, %v1093_v63  ;;  %v3529_v36 = vld [vmem:[#allocation35_spill] sm:$0xff]  ;;  %v3530_v63 = vld [vmem:[#allocation22_spill] sm:$0xff] }
 0x17a   :  { %v1343_v58 = vadd.f32 %v1244_v20, %v747_v53  ;;  %v1629_v33 = vmul.f32 %v1597_v9, %v1533_v47  ;;  %2119 = vtanh.f32 %v1506_v5  ;;  %v1177_v40 = vadd.f32 %v1145_v56, %v1095_v24  ;;  %v3531_v20 = vld [vmem:[#allocation23_spill] sm:$0xff] }
 0x17b   :  { %v1345_v50 = vadd.f32 %v1246_v46, %v749_v49  ;;  %v1277_v44 = vrot.slane %v1175_v41, 1  ;;  %v543_v51 = vmul.f32 %v2360_v7, %v2548_v15  ;;  %v545_v14 = vmul.f32 %v2360_v7, %v2563_v4 }
 0x17c   :  { %v594_v59 = vmul.f32 %v2372_v16, %v2563_v4  ;;  %v1657_v19 = vpack.c.bf16 %v1629_v33, %v1627_v3  ;;  %v1536_v29 = vmul.f32 0.5, %v1376_v34  ;;  %v1279_v37 = vrot.slane %v1177_v40, 1  ;;  %v3532_v40 = vld [vmem:[#allocation36_spill] sm:$0xff] }
 0x17d   :  { %v804_v53 = vmul.f32 %v2364_v11, %v2563_v4  ;;  %v1311_v47 = vsel %vm1268_vm1, %v1277_v44, 0.0  ;;  %v628_v62 = vadd.f32 %v2601_v6, %v545_v14  ;;  %v852_v25 = vmul.f32 %v2374_v17, %v2563_v4 }
 0x17e   :  { %v626_v49 = vadd.f32 %v594_v59, %v543_v51  ;;  %1847 = vmatmul.mubr.bf16.gmra.mxu1 %v1657_v19  ;;  %v1313_v56 = vsel %vm1268_vm1, %v1279_v37, 0.0  ;;  %v1375_v28 = vadd.f32 %v1343_v58, %v1311_v47  ;;  %v802_v34 = vmul.f32 %v2364_v11, %v2548_v15  ;;  %v3533_v51 = vld [vmem:[#allocation37_spill] sm:$0xff]  ;;  %v3534_v19 = vld [vmem:[#allocation31_spill] sm:$0xff] }
 0x17f   :  { %v886_v2 = vadd.f32 %v2609_v57, %v804_v53  ;;  %v1538_v10 = vmul.f32 0.5, %v2898_v54  ;;  %v1377_v52 = vadd.f32 %v1345_v50, %v1313_v56  ;;  %v711_v6 = vadd.f32 %v3530_v63, %v628_v62 }
 0x180   :  { %v709_v5 = vadd.f32 %v3529_v36, %v626_v49  ;;  %v1407_v9 = vmul.f32 %v1375_v28, %v1375_v28  ;;  %v884_v24 = vadd.f32 %v852_v25, %v802_v34  ;;  %v1018_v3 = vmul.f32 %v2376_v18, %v2563_v4  ;;  %v3535_v25 = vld [vmem:[#allocation24_spill] sm:$0xff] }
 0x181   :  { %v968_v46 = vadd.f32 %v3531_v20, %v886_v2  ;;  %v1409_v41 = vmul.f32 %v1377_v52, %v1377_v52  ;;  %v754_v33 = vadd.f32 %v2408_v35, %v711_v6  ;;  %v1016_v57 = vmul.f32 %v2376_v18, %v2548_v15 }
 0x182   :  { %v752_v58 = vadd.f32 %v2408_v35, %v709_v5  ;;  %v1439_v54 = vmul.f32 0.035677407, %v1407_v9  ;;  %v966_v50 = vadd.f32 %v3532_v40, %v884_v24  ;;  %v1066_v44 = vmul.f32 %v2385_v23, %v2563_v4 }
 0x183   :  { %v1100_v14 = vadd.f32 %v3533_v51, %v1018_v3  ;;  %v1441_v59 = vmul.f32 0.035677407, %v1409_v41  ;;  %v1148_v37 = vmul.f32 %v2403_v32, %v3534_v19  ;;  %v1217_v53 = vrot.slane %v968_v46, 7 }
 0x184   :  { %v542_v47 = vmul.f32 %v2354_v60, %v2539_v43  ;;  %v1471_v49 = vadd.f32 0.7978846, %v1439_v54  ;;  %v1098_v62 = vadd.f32 %v1066_v44, %v1016_v57  ;;  %v1215_v56 = vrot.slane %v966_v50, 7 }
 0x185   :  { %v1182_v15 = vadd.f32 %v3535_v25, %v1100_v14  ;;  %v1473_v34 = vadd.f32 0.7978846, %v1441_v59  ;;  %v1251_v2 = vsel %vm1201_vm0, %v1217_v53, 0.0  ;;  %v544_v4 = vmul.f32 %v2354_v60, %v2560_v48 }
 0x186   :  { %v593_v36 = vmul.f32 %v2356_v61, %v2560_v48  ;;  %v2118_v5 = vpop.eup %2117  ;;  %v1503_v6 = vmul.f32 %v1471_v49, %v1375_v28  ;;  %v1180_v9 = vadd.f32 %v1148_v37, %v1098_v62  ;;  %v1249_v24 = vsel %vm1201_vm0, %v1215_v56, 0.0  ;;  %v3536_v62 = vld [vmem:[#allocation29_spill] sm:$0xff]  ;;  %v3537_v56 = vld [vmem:[#allocation30_spill] sm:$0xff] }
 0x187   :  { %v1284_v46 = vrot.slane %v1182_v15, 1  ;;  %v2120_v3 = vpop.eup %2119  ;;  %v1600_v41 = vadd.f32 1.0, %v2118_v5  ;;  %v1505_v57 = vmul.f32 %v1473_v34, %v1377_v52  ;;  %v1348_v54 = vadd.f32 %v1249_v24, %v752_v58 }
 0x188   :  { %v1350_v40 = vadd.f32 %v1251_v2, %v754_v33  ;;  %v1602_v50 = vadd.f32 1.0, %v2120_v3  ;;  %2121 = vtanh.f32 %v1503_v6  ;;  %v1282_v44 = vrot.slane %v1180_v9, 1  ;;  %v3539_v3 = vld [vmem:[#allocation32_spill] sm:$0xff] }
 0x189   :  { %v1318_v51 = vsel %vm1268_vm1, %v1284_v46, 0.0  ;;  %v2978_v14 = vmul.f32 0.5, %v1375_v28  ;;  %2123 = vtanh.f32 %v1505_v57  ;;  %v625_v19 = vadd.f32 %v593_v36, %v542_v47  ;;  %v3538_v28 = vld [vmem:[#allocation25_spill] sm:$0xff] }
 0x18a   :  { %v1382_v59 = vadd.f32 %v1350_v40, %v1318_v51  ;;  %v1632_v37 = vmul.f32 %v1600_v41, %v1536_v29  ;;  %v1634_v53 = vmul.f32 %v1602_v50, %v1538_v10  ;;  %v1316_v49 = vsel %vm1268_vm1, %v1282_v44, 0.0  ;;  %v3540_v44 = vld [vmem:[#allocation33_spill] sm:$0xff] }
 0x18b   :  { %v627_v15 = vadd.f32 %v3536_v62, %v544_v4  ;;  %v1380_v58 = vadd.f32 %v1348_v54, %v1316_v49  ;;  %v708_v34 = vadd.f32 %v3537_v56, %v625_v19  ;;  %v801_v2 = vmul.f32 %v2358_v0, %v2539_v43  ;;  %v3541_v19 = vld [vmem:[#allocation26_spill] sm:$0xff]  ;;  %v3543_v62 = vld [vmem:[#allocation51_spill] sm:$0xff] }
 0x18c   :  { %v1414_v33 = vmul.f32 %v1382_v59, %v1382_v59  ;;  %v1660_v5 = vpack.c.bf16 %v1634_v53, %v1632_v37  ;;  %v803_v47 = vmul.f32 %v2358_v0, %v2560_v48  ;;  %v851_v29 = vmul.f32 %v2362_v8, %v2560_v48  ;;  %v3542_v53 = vld [vmem:[#allocation28_spill] sm:$0xff] }
 0x18d   :  { %v710_v6 = vadd.f32 %v3538_v28, %v627_v15  ;;  %v1537_v10 = vmul.f32 0.5, %v1377_v52  ;;  %v1412_v36 = vmul.f32 %v1380_v58, %v1380_v58  ;;  %v751_v4 = vadd.f32 %v2401_v31, %v708_v34  ;;  %v3544_v34 = vld [vmem:[#allocation34_spill] sm:$0xff] }
 0x18e   :  { %v1446_v9 = vmul.f32 0.035677407, %v1414_v33  ;;  %1854 = vmatprep.mubr.bf16.mxu1 %v1660_v5  ;;  %v883_v46 = vadd.f32 %v851_v29, %v801_v2  ;;  %v885_v41 = vadd.f32 %v3539_v3, %v803_v47  ;;  %v1015_v57 = vmul.f32 %v2366_v12, %v2539_v43  ;;  %v3545_v47 = vld [vmem:[#allocation16_spill] sm:$0xff]  ;;  %v3546_v29 = vld [vmem:[#allocation46_spill] sm:$0xff] }
 0x18f   :  { %v753_v24 = vadd.f32 %v2401_v31, %v710_v6  ;;  %v1444_v54 = vmul.f32 0.035677407, %v1412_v36  ;;  %v1017_v50 = vmul.f32 %v2366_v12, %v2560_v48  ;;  %v1065_v52 = vmul.f32 %v2368_v13, %v2560_v48  ;;  %v3547_v36 = vld [vmem:[#allocation45_spill] sm:$0xff] }
 0x190   :  { %v1478_v40 = vadd.f32 0.7978846, %v1446_v9  ;;  %v965_v51 = vadd.f32 %v3540_v44, %v883_v46  ;;  %v967_v37 = vadd.f32 %v3541_v19, %v885_v41  ;;  %v1147_v49 = vmul.f32 %v2416_v38, %v3542_v53  ;;  %v3548_v41 = vld [vmem:[#allocation27_spill] sm:$0xff] }
 0x191   :  { %v600_v15 = vmul.f32 %v2372_v16, %v3543_v62  ;;  %v1476_v33 = vadd.f32 0.7978846, %v1444_v54  ;;  %v1097_v56 = vadd.f32 %v1065_v52, %v1015_v57  ;;  %v1099_v2 = vadd.f32 %v3544_v34, %v1017_v50 }
 0x192   :  { %v1510_v43 = vmul.f32 %v1478_v40, %v1382_v59  ;;  %v1214_v5 = vrot.slane %v965_v51, 7  ;;  %v1216_v6 = vrot.slane %v967_v37, 7  ;;  %v630_v48 = vadd.f32 %v3546_v29, %v3545_v47 }
 0x193   :  { %v632_v9 = vadd.f32 %v600_v15, %v3547_v36  ;;  %v1508_v46 = vmul.f32 %v1476_v33, %v1380_v58  ;;  %v1179_v3 = vadd.f32 %v1147_v49, %v1097_v56  ;;  %v1181_v44 = vadd.f32 %v3548_v41, %v1099_v2 }
 0x194   :  { %2125 = vtanh.f32 %v1510_v43  ;;  %v1248_v53 = vsel %vm1201_vm0, %v1214_v5, 0.0  ;;  %v1250_v57 = vsel %vm1201_vm0, %v1216_v6, 0.0  ;;  %v681_v54 = vmul.f32 %v2390_v26, %v3543_v62 }
 0x195   :  { %v683_v40 = vmul.f32 %v2390_v26, %v2700_v30  ;;  %v2122_v50 = vpop.eup %2121  ;;  %2127 = vtanh.f32 %v1508_v46  ;;  %v1281_v52 = vrot.slane %v1179_v3, 1  ;;  %v1283_v51 = vrot.slane %v1181_v44, 1 }
 0x196   :  { %v1347_v37 = vadd.f32 %v1248_v53, %v751_v4  ;;  %v2124_v49 = vpop.eup %2123  ;;  %v1599_v15 = vadd.f32 1.0, %v2122_v50  ;;  %v1349_v33 = vadd.f32 %v1250_v57, %v753_v24  ;;  %v713_v43 = vadd.f32 %v681_v54, %v630_v48  ;;  %v3549_v53 = vld [vmem:[#allocation17_spill] sm:$0xff]  ;;  %v3550_v57 = vld [vmem:[#allocation48_spill] sm:$0xff] }
 0x197   :  { %v715_v56 = vadd.f32 %v683_v40, %v632_v9  ;;  %v1601_v34 = vadd.f32 1.0, %v2124_v49  ;;  %v1315_v2 = vsel %vm1268_vm1, %v1281_v52, 0.0  ;;  %v1317_v5 = vsel %vm1268_vm1, %v1283_v51, 0.0  ;;  %v3551_v40 = vld [vmem:[#allocation47_spill] sm:$0xff]  ;;  %v3553_v49 = vld [vmem:[#allocation50_spill] sm:$0xff] }
 0x198   :  { %v858_v6 = vmul.f32 %v2374_v17, %v3543_v62  ;;  %v1540_v47 = vmul.f32 0.5, %v1380_v58  ;;  %v1542_v29 = vmul.f32 0.5, %v1382_v59  ;;  %v1379_v36 = vadd.f32 %v1347_v37, %v1315_v2  ;;  %v3552_v37 = vld [vmem:[#allocation20_spill] sm:$0xff] }
 0x199   :  { %v1381_v46 = vadd.f32 %v1349_v33, %v1317_v5  ;;  %v1631_v4 = vmul.f32 %v1599_v15, %v2978_v14  ;;  %v1633_v3 = vmul.f32 %v1601_v34, %v1537_v10  ;;  %v756_v24 = vadd.f32 %v2408_v35, %v713_v43  ;;  %v3554_v34 = vld [vmem:[#allocation49_spill] sm:$0xff] }
 0x19a   :  { %v758_v48 = vadd.f32 %v2408_v35, %v715_v56  ;;  %v1411_v9 = vmul.f32 %v1379_v36, %v1379_v36  ;;  %v888_v54 = vadd.f32 %v3550_v57, %v3549_v53  ;;  %v890_v50 = vadd.f32 %v858_v6, %v3551_v40  ;;  %v3555_v40 = vld [vmem:[#allocation44_spill] sm:$0xff] }
 0x19b   :  { %v1413_v44 = vmul.f32 %v1381_v46, %v1381_v46  ;;  %v1659_v52 = vpack.c.bf16 %v1633_v3, %v1631_v4  ;;  %v938_v59 = vmul.f32 %v2392_v27, %v3543_v62  ;;  %v940_v58 = vmul.f32 %v2392_v27, %v2700_v30 }
 0x19c   :  { %v1072_v14 = vmul.f32 %v2385_v23, %v3543_v62  ;;  %v1443_v10 = vmul.f32 0.035677407, %v1411_v9  ;;  %v1102_v15 = vadd.f32 %v3553_v49, %v3552_v37  ;;  %v1152_v33 = vmul.f32 %v2403_v32, %v3543_v62 }
 0x19d   :  { %v1445_v51 = vmul.f32 0.035677407, %v1413_v44  ;;  %1855 = vmatmul.mubr.bf16.gmra.mxu1 %v1659_v52  ;;  %v970_v43 = vadd.f32 %v938_v59, %v888_v54  ;;  %v972_v56 = vadd.f32 %v940_v58, %v890_v50  ;;  %v1154_v5 = vmul.f32 %v2403_v32, %v2700_v30  ;;  %v3556_v59 = vld [vmem:[#allocation18_spill] sm:$0xff]  ;;  %v3557_v58 = vld [vmem:[#allocation39_spill] sm:$0xff] }
 0x19e   :  { %v1104_v2 = vadd.f32 %v1072_v14, %v3554_v34  ;;  %v1475_v6 = vadd.f32 0.7978846, %v1443_v10  ;;  %v3044_v3 = vmul.f32 0.5, %v1379_v36  ;;  %v1184_v9 = vadd.f32 %v1152_v33, %v1102_v15 }
 0x19f   :  { %v1477_v4 = vadd.f32 0.7978846, %v1445_v51  ;;  %v1219_v53 = vrot.slane %v970_v43, 7  ;;  %v1221_v57 = vrot.slane %v972_v56, 7  ;;  %v599_v37 = vmul.f32 %v2356_v61, %v3555_v40 }
 0x1a0   :  { %v1186_v44 = vadd.f32 %v1154_v5, %v1104_v2  ;;  %v1507_v52 = vmul.f32 %v1475_v6, %v1379_v36  ;;  %v1286_v50 = vrot.slane %v1184_v9, 1  ;;  %v629_v14 = vadd.f32 %v3557_v58, %v3556_v59  ;;  %v3560_v58 = vld [vmem:[#allocation19_spill] sm:$0xff] }
 0x1a1   :  { %v2126_v49 = vpop.eup %2125  ;;  %v1509_v54 = vmul.f32 %v1477_v4, %v1381_v46  ;;  %v1253_v10 = vsel %vm1201_vm0, %v1219_v53, 0.0  ;;  %v1255_v51 = vsel %vm1201_vm0, %v1221_v57, 0.0  ;;  %v680_v53 = vmul.f32 %v2381_v21, %v3555_v40 }
 0x1a2   :  { %v1606_v34 = vadd.f32 1.0, %v2126_v49  ;;  %v1288_v15 = vrot.slane %v1186_v44, 1  ;;  %v2128_v33 = vpop.eup %2127  ;;  %2129 = vtanh.f32 %v1507_v52  ;;  %v1320_v43 = vsel %vm1268_vm1, %v1286_v50, 0.0  ;;  %v3558_v44 = vld [vmem:[#allocation52_spill] sm:$0xff]  ;;  %v3559_v52 = vld [vmem:[#allocation38_spill] sm:$0xff] }
 0x1a3   :  { %v1352_v56 = vadd.f32 %v1253_v10, %v756_v24  ;;  %v1354_v36 = vadd.f32 %v1255_v51, %v758_v48  ;;  %v1604_v2 = vadd.f32 1.0, %v2128_v33  ;;  %2131 = vtanh.f32 %v1509_v54 }
 0x1a4   :  { %v1638_v5 = vmul.f32 %v1606_v34, %v1542_v29  ;;  %v1322_v6 = vsel %vm1268_vm1, %v1288_v15, 0.0  ;;  %v682_v57 = vmul.f32 %v2381_v21, %v3558_v44  ;;  %v631_v50 = vadd.f32 %v599_v37, %v3559_v52  ;;  %v3561_v34 = vld [vmem:[#allocation41_spill] sm:$0xff] }
 0x1a5   :  { %v1384_v4 = vadd.f32 %v1352_v56, %v1320_v43  ;;  %v3058_v9 = vadd.f32 %v1354_v36, %v1322_v6  ;;  %v1636_v49 = vmul.f32 %v1604_v2, %v1540_v47  ;;  %v857_v24 = vmul.f32 %v2362_v8, %v3555_v40  ;;  %v3562_v47 = vld [vmem:[#allocation40_spill] sm:$0xff] }
 0x1a6   :  { %v937_v29 = vmul.f32 %v2383_v22, %v3555_v40  ;;  %v1541_v48 = vmul.f32 0.5, %v1381_v46  ;;  %v887_v10 = vadd.f32 %v3561_v34, %v3560_v58  ;;  %v712_v15 = vadd.f32 %v680_v53, %v629_v14  ;;  %v3563_v58 = vld [vmem:[#allocation21_spill] sm:$0xff] }
 0x1a7   :  { %v1416_v54 = vmul.f32 %v1384_v4, %v1384_v4  ;;  %v1418_v59 = vmul.f32 %v3058_v9, %v3058_v9  ;;  %v1662_v51 = vpack.c.bf16 %v1638_v5, %v1636_v49  ;;  %v714_v33 = vadd.f32 %v682_v57, %v631_v50  ;;  %v3564_v5 = vld [vmem:[#allocation43_spill] sm:$0xff] }
 0x1a8   :  { %v889_v43 = vadd.f32 %v857_v24, %v3562_v47  ;;  %v939_v36 = vmul.f32 %v2383_v22, %v3558_v44  ;;  %v969_v2 = vadd.f32 %v937_v29, %v887_v10  ;;  %v755_v46 = vadd.f32 %v2401_v31, %v712_v15  ;;  %v3565_v24 = vld [vmem:[#allocation42_spill] sm:$0xff] }
 0x1a9   :  { %v1448_v37 = vmul.f32 0.035677407, %v1416_v54  ;;  %v1450_v56 = vmul.f32 0.035677407, %v1418_v59  ;;  %1862 = vmatprep.mubr.bf16.mxu1 %v1662_v51  ;;  %v757_v6 = vadd.f32 %v2401_v31, %v714_v33  ;;  %v1071_v52 = vmul.f32 %v2368_v13, %v3555_v40 }
 0x1aa   :  { %v1101_v14 = vadd.f32 %v3564_v5, %v3563_v58  ;;  %v971_v49 = vadd.f32 %v939_v36, %v889_v43  ;;  %v1151_v50 = vmul.f32 %v2416_v38, %v3555_v40  ;;  %v1153_v29 = vmul.f32 %v2416_v38, %v3558_v44 }
 0x1ab   :  { %v1480_v53 = vadd.f32 0.7978846, %v1448_v37  ;;  %v1482_v57 = vadd.f32 0.7978846, %v1450_v56  ;;  %v1103_v54 = vadd.f32 %v1071_v52, %v3565_v24  ;;  %v1218_v59 = vrot.slane %v969_v2, 7 }
 0x1ac   :  { %v551_v34 = vmul.f32 %v2360_v7, %v3543_v62  ;;  %v1183_v15 = vadd.f32 %v1151_v50, %v1101_v14  ;;  %v1220_v33 = vrot.slane %v971_v49, 7  ;;  %v553_v37 = vmul.f32 %v2360_v7, %v2700_v30 }
 0x1ad   :  { %v1512_v10 = vmul.f32 %v1480_v53, %v1384_v4  ;;  %v1514_v51 = vmul.f32 %v1482_v57, %v3058_v9  ;;  %v1185_v47 = vadd.f32 %v1153_v29, %v1103_v54  ;;  %v1252_v43 = vsel %vm1201_vm0, %v1218_v59, 0.0  ;;  %v3566_v53 = vld [vmem:[#allocation54_spill] sm:$0xff] }
 0x1ae   :  { %v602_v56 = vmul.f32 %v2372_v16, %v2700_v30  ;;  %v1254_v36 = vsel %vm1201_vm0, %v1220_v33, 0.0  ;;  %v1285_v2 = vrot.slane %v1183_v15, 1  ;;  %v1351_v52 = vadd.f32 %v1252_v43, %v755_v46  ;;  %v3567_v33 = vld [vmem:[#allocation56_spill] sm:$0xff] }
 0x1af   :  { %2133 = vtanh.f32 %v1512_v10  ;;  %v2130_v58 = vpop.eup %2129  ;;  %v1287_v5 = vrot.slane %v1185_v47, 1  ;;  %v1353_v14 = vadd.f32 %v1254_v36, %v757_v6  ;;  %v604_v57 = vmul.f32 %v2372_v16, %v3566_v53 }
 0x1b0   :  { %2135 = vtanh.f32 %v1514_v51  ;;  %v2132_v49 = vpop.eup %2131  ;;  %v1603_v50 = vadd.f32 1.0, %v2130_v58  ;;  %v1319_v24 = vsel %vm1268_vm1, %v1285_v2, 0.0  ;;  %v634_v54 = vadd.f32 %v602_v56, %v551_v34 }
 0x1b1   :  { %v685_v29 = vmul.f32 %v2390_v26, %v3566_v53  ;;  %v1605_v59 = vadd.f32 1.0, %v2132_v49  ;;  %v1544_v10 = vmul.f32 0.5, %v1384_v4  ;;  %v1321_v46 = vsel %vm1268_vm1, %v1287_v5, 0.0 }
 0x1b2   :  { %v3106_v51 = vadd.f32 %v1351_v52, %v1319_v24  ;;  %v3108_v6 = vadd.f32 %v1353_v14, %v1321_v46  ;;  %v636_v15 = vadd.f32 %v604_v57, %v553_v37  ;;  %v687_v47 = vmul.f32 %v2390_v26, %v3567_v33 }
 0x1b3   :  { %v717_v43 = vadd.f32 %v685_v29, %v634_v54  ;;  %v1635_v36 = vmul.f32 %v1603_v50, %v3044_v3  ;;  %v1637_v34 = vmul.f32 %v1605_v59, %v1541_v48  ;;  %v1546_v56 = vmul.f32 0.5, %v3058_v9 }
 0x1b4   :  { %v1415_v4 = vmul.f32 %v3106_v51, %v3106_v51  ;;  %v1417_v2 = vmul.f32 %v3108_v6, %v3108_v6  ;;  %v719_v52 = vadd.f32 %v687_v47, %v636_v15  ;;  %v810_v37 = vmul.f32 %v2364_v11, %v3543_v62 }
 0x1b5   :  { %v760_v58 = vadd.f32 %v2408_v35, %v717_v43  ;;  %v1661_v5 = vpack.c.bf16 %v1637_v34, %v1635_v36  ;;  %v812_v3 = vmul.f32 %v2364_v11, %v2700_v30  ;;  %v860_v9 = vmul.f32 %v2374_v17, %v2700_v30 }
 0x1b6   :  { %v1447_v14 = vmul.f32 0.035677407, %v1415_v4  ;;  %v1449_v48 = vmul.f32 0.035677407, %v1417_v2  ;;  %v762_v57 = vadd.f32 %v2408_v35, %v719_v52  ;;  %v862_v49 = vmul.f32 %v2374_v17, %v3566_v53 }
 0x1b7   :  { %v942_v50 = vmul.f32 %v2392_v27, %v3566_v53  ;;  %1863 = vmatmul.mubr.bf16.gmra.mxu1 %v1661_v5  ;;  %v892_v54 = vadd.f32 %v860_v9, %v810_v37  ;;  %v944_v29 = vmul.f32 %v2392_v27, %v3567_v33  ;;  %v1024_v59 = vmul.f32 %v2376_v18, %v3543_v62 }
 0x1b8   :  { %v1479_v24 = vadd.f32 0.7978846, %v1447_v14  ;;  %v1481_v46 = vadd.f32 0.7978846, %v1449_v48  ;;  %v894_v15 = vadd.f32 %v862_v49, %v812_v3  ;;  %v1026_v47 = vmul.f32 %v2376_v18, %v2700_v30 }
 0x1b9   :  { %v1074_v43 = vmul.f32 %v2385_v23, %v2700_v30  ;;  %v974_v34 = vadd.f32 %v942_v50, %v892_v54  ;;  %v1076_v4 = vmul.f32 %v2385_v23, %v3566_v53  ;;  %v1156_v2 = vmul.f32 %v2403_v32, %v3566_v53 }
 0x1ba   :  { %v1511_v36 = vmul.f32 %v1479_v24, %v3106_v51  ;;  %v1513_v52 = vmul.f32 %v1481_v46, %v3108_v6  ;;  %v976_v62 = vadd.f32 %v944_v29, %v894_v15  ;;  %v1158_v5 = vmul.f32 %v2403_v32, %v3567_v33 }
 0x1bb   :  { %v1106_v37 = vadd.f32 %v1074_v43, %v1024_v59  ;;  %v1108_v3 = vadd.f32 %v1076_v4, %v1026_v47  ;;  %v1223_v30 = vrot.slane %v974_v34, 7  ;;  %v550_v9 = vmul.f32 %v2354_v60, %v3555_v40 }
 0x1bc   :  { %v2134_v14 = vpop.eup %2133  ;;  %2137 = vtanh.f32 %v1511_v36  ;;  %v1225_v24 = vrot.slane %v976_v62, 7  ;;  %v552_v59 = vmul.f32 %v2354_v60, %v3558_v44  ;;  %v3568_v62 = vld [vmem:[#allocation53_spill] sm:$0xff] }
 0x1bd   :  { %v2136_v48 = vpop.eup %2135  ;;  %v1608_v49 = vadd.f32 1.0, %v2134_v14  ;;  %2139 = vtanh.f32 %v1513_v52  ;;  %v1188_v50 = vadd.f32 %v1156_v2, %v1106_v37  ;;  %v1190_v41 = vadd.f32 %v1158_v5, %v1108_v3  ;;  %v3569_v5 = vld [vmem:[#allocation55_spill] sm:$0xff] }
 0x1be   :  { %v1610_v54 = vadd.f32 1.0, %v2136_v48  ;;  %v1257_v29 = vsel %vm1201_vm0, %v1223_v30, 0.0  ;;  %v1259_v15 = vsel %vm1201_vm0, %v1225_v24, 0.0  ;;  %v601_v2 = vmul.f32 %v2356_v61, %v3558_v44 }
 0x1bf   :  { %v1640_v46 = vmul.f32 %v1608_v49, %v1544_v10  ;;  %v1290_v47 = vrot.slane %v1188_v50, 1  ;;  %v1356_v43 = vadd.f32 %v1257_v29, %v760_v58  ;;  %v1292_v34 = vrot.slane %v1190_v41, 1 }
 0x1c0   :  { %v1642_v36 = vmul.f32 %v1610_v54, %v1546_v56  ;;  %v1358_v4 = vadd.f32 %v1259_v15, %v762_v57  ;;  %v603_v37 = vmul.f32 %v2356_v61, %v3568_v62  ;;  %v684_v10 = vmul.f32 %v2381_v21, %v3568_v62 }
 0x1c1   :  { %v1324_v52 = vsel %vm1268_vm1, %v1290_v47, 0.0  ;;  %v686_v14 = vmul.f32 %v2381_v21, %v3569_v5  ;;  %v1326_v41 = vsel %vm1268_vm1, %v1292_v34, 0.0  ;;  %v633_v58 = vadd.f32 %v601_v2, %v550_v9 }
 0x1c2   :  { %v1664_v3 = vpack.c.bf16 %v1642_v36, %v1640_v46  ;;  %v3166_v56 = vadd.f32 %v1356_v43, %v1324_v52  ;;  %v1543_v57 = vmul.f32 0.5, %v3106_v51  ;;  %v1545_v30 = vmul.f32 0.5, %v3108_v6 }
 0x1c3   :  { %v3170_v48 = vadd.f32 %v1358_v4, %v1326_v41  ;;  %v635_v49 = vadd.f32 %v603_v37, %v552_v59  ;;  %v716_v24 = vadd.f32 %v684_v10, %v633_v58  ;;  %v809_v54 = vmul.f32 %v2358_v0, %v3555_v40 }
 0x1c4   :  { %1870 = vmatprep.mubr.bf16.mxu1 %v1664_v3  ;;  %v1420_v50 = vmul.f32 %v3166_v56, %v3166_v56  ;;  %v859_v29 = vmul.f32 %v2362_v8, %v3558_v44  ;;  %v811_v6 = vmul.f32 %v2358_v0, %v3558_v44  ;;  %v861_v59 = vmul.f32 %v2362_v8, %v3568_v62 }
 0x1c5   :  { %v1422_v9 = vmul.f32 %v3170_v48, %v3170_v48  ;;  %v718_v51 = vadd.f32 %v686_v14, %v635_v49  ;;  %v759_v15 = vadd.f32 %v2401_v31, %v716_v24  ;;  %v941_v43 = vmul.f32 %v2383_v22, %v3568_v62 }
 0x1c6   :  { %v1452_v46 = vmul.f32 0.035677407, %v1420_v50  ;;  %v891_v47 = vadd.f32 %v859_v29, %v809_v54  ;;  %v893_v4 = vadd.f32 %v861_v59, %v811_v6  ;;  %v943_v2 = vmul.f32 %v2383_v22, %v3569_v5 }
 0x1c7   :  { %v1454_v36 = vmul.f32 0.035677407, %v1422_v9  ;;  %v761_v34 = vadd.f32 %v2401_v31, %v718_v51  ;;  %v1023_v10 = vmul.f32 %v2366_v12, %v3555_v40  ;;  %v1025_v14 = vmul.f32 %v2366_v12, %v3558_v44 }
 0x1c8   :  { %v1484_v52 = vadd.f32 0.7978846, %v1452_v46  ;;  %v973_v37 = vadd.f32 %v941_v43, %v891_v47  ;;  %v975_v58 = vadd.f32 %v943_v2, %v893_v4  ;;  %v1073_v49 = vmul.f32 %v2368_v13, %v3558_v44 }
 0x1c9   :  { %v2138_v3 = vpop.eup %2137  ;;  %v1486_v41 = vadd.f32 0.7978846, %v1454_v36  ;;  %v1075_v50 = vmul.f32 %v2368_v13, %v3568_v62  ;;  %v1155_v9 = vmul.f32 %v2416_v38, %v3568_v62  ;;  %v1157_v40 = vmul.f32 %v2416_v38, %v3569_v5 }
 0x1ca   :  { %v2140_v24 = vpop.eup %2139  ;;  %v1607_v54 = vadd.f32 1.0, %v2138_v3  ;;  %v1516_v29 = vmul.f32 %v1484_v52, %v3166_v56  ;;  %v1105_v59 = vadd.f32 %v1073_v49, %v1023_v10  ;;  %v1222_v44 = vrot.slane %v973_v37, 7  ;;  %v3570_v49 = vld [vmem:[#allocation58_spill] sm:$0xff] }
 0x1cb   :  { %v1609_v51 = vadd.f32 1.0, %v2140_v24  ;;  %v1518_v6 = vmul.f32 %v1486_v41, %v3170_v48  ;;  %v1107_v46 = vadd.f32 %v1075_v50, %v1025_v14  ;;  %v1224_v43 = vrot.slane %v975_v58, 7 }
 0x1cc   :  { %v1639_v47 = vmul.f32 %v1607_v54, %v1543_v57  ;;  %2141 = vtanh.f32 %v1516_v29  ;;  %v1187_v4 = vadd.f32 %v1155_v9, %v1105_v59  ;;  %v1256_v52 = vsel %vm1201_vm0, %v1222_v44, 0.0 }
 0x1cd   :  { %v1641_v36 = vmul.f32 %v1609_v51, %v1545_v30  ;;  %2143 = vtanh.f32 %v1518_v6  ;;  %v1189_v2 = vadd.f32 %v1157_v40, %v1107_v46  ;;  %v1258_v3 = vsel %vm1201_vm0, %v1224_v43, 0.0 }
 0x1ce   :  { %v555_v24 = vmul.f32 %v2360_v7, %v3566_v53  ;;  %v557_v10 = vmul.f32 %v2360_v7, %v3567_v33  ;;  %v1289_v14 = vrot.slane %v1187_v4, 1  ;;  %v1355_v41 = vadd.f32 %v1256_v52, %v759_v15 }
 0x1cf   :  { %v1663_v57 = vpack.c.bf16 %v1641_v36, %v1639_v47  ;;  %v1291_v37 = vrot.slane %v1189_v2, 1  ;;  %v1357_v30 = vadd.f32 %v1258_v3, %v761_v34  ;;  %v606_v58 = vmul.f32 %v2372_v16, %v3567_v33 }
 0x1d0   :  { %v608_v50 = vmul.f32 %v2372_v16, %v3570_v49  ;;  %v689_v54 = vmul.f32 %v2390_v26, %v3570_v49  ;;  %v1323_v29 = vsel %vm1268_vm1, %v1289_v14, 0.0  ;;  %v691_v15 = vmul.f32 %v2390_v26, %v2764_v1 }
 0x1d1   :  { %1871 = vmatmul.mubr.bf16.gmra.mxu1 %v1663_v57  ;;  %v1325_v9 = vsel %vm1268_vm1, %v1291_v37, 0.0  ;;  %v814_v34 = vmul.f32 %v2364_v11, %v3566_v53  ;;  %v1387_v40 = vadd.f32 %v1355_v41, %v1323_v29  ;;  %v638_v6 = vadd.f32 %v606_v58, %v555_v24 }
 0x1d2   :  { %v3226_v51 = vadd.f32 %v1357_v30, %v1325_v9  ;;  %v640_v59 = vadd.f32 %v608_v50, %v557_v10  ;;  %v816_v46 = vmul.f32 %v2364_v11, %v3567_v33  ;;  %v864_v47 = vmul.f32 %v2374_v17, %v3567_v33 }
 0x1d3   :  { %v866_v44 = vmul.f32 %v2374_v17, %v3570_v49  ;;  %v946_v26 = vmul.f32 %v2392_v27, %v3570_v49  ;;  %v1548_v43 = vmul.f32 0.5, %v3166_v56  ;;  %v1550_v36 = vmul.f32 0.5, %v3170_v48 }
 0x1d4   :  { %v1419_v4 = vmul.f32 %v1387_v40, %v1387_v40  ;;  %v1421_v2 = vmul.f32 %v3226_v51, %v3226_v51  ;;  %v721_v52 = vadd.f32 %v689_v54, %v638_v6  ;;  %v723_v3 = vadd.f32 %v691_v15, %v640_v59 }
 0x1d5   :  { %v896_v24 = vadd.f32 %v864_v47, %v814_v34  ;;  %v898_v10 = vadd.f32 %v866_v44, %v816_v46  ;;  %v948_v37 = vmul.f32 %v2392_v27, %v2764_v1  ;;  %v1028_v41 = vmul.f32 %v2376_v18, %v3566_v53 }
 0x1d6   :  { %v1451_v57 = vmul.f32 0.035677407, %v1419_v4  ;;  %v1453_v14 = vmul.f32 0.035677407, %v1421_v2  ;;  %v764_v56 = vadd.f32 %v2408_v35, %v721_v52  ;;  %v766_v48 = vadd.f32 %v2408_v35, %v723_v3 }
 0x1d7   :  { %v978_v30 = vadd.f32 %v946_v26, %v896_v24  ;;  %v1030_v58 = vmul.f32 %v2376_v18, %v3567_v33  ;;  %v980_v29 = vadd.f32 %v948_v37, %v898_v10  ;;  %v1078_v9 = vmul.f32 %v2385_v23, %v3567_v33 }
 0x1d8   :  { %v1483_v50 = vadd.f32 0.7978846, %v1451_v57  ;;  %v1485_v54 = vadd.f32 0.7978846, %v1453_v14  ;;  %v1080_v27 = vmul.f32 %v2385_v23, %v3570_v49  ;;  %v1160_v53 = vmul.f32 %v2403_v32, %v3570_v49 }
 0x1d9   :  { %v2142_v15 = vpop.eup %2141  ;;  %v1162_v34 = vmul.f32 %v2403_v32, %v2764_v1  ;;  %v1227_v6 = vrot.slane %v978_v30, 7  ;;  %v1110_v26 = vadd.f32 %v1078_v9, %v1028_v41  ;;  %v1229_v33 = vrot.slane %v980_v29, 7  ;;  %v3571_v9 = vld [vmem:[#allocation57_spill] sm:$0xff] }
 0x1da   :  { %v2144_v59 = vpop.eup %2143  ;;  %v1612_v46 = vadd.f32 1.0, %v2142_v15  ;;  %v1515_v47 = vmul.f32 %v1483_v50, %v1387_v40  ;;  %v1517_v44 = vmul.f32 %v1485_v54, %v3226_v51  ;;  %v1112_v2 = vadd.f32 %v1080_v27, %v1030_v58 }
 0x1db   :  { %v1614_v4 = vadd.f32 1.0, %v2144_v59  ;;  %v1261_v52 = vsel %vm1201_vm0, %v1227_v6, 0.0  ;;  %v1192_v24 = vadd.f32 %v1160_v53, %v1110_v26  ;;  %v1263_v37 = vsel %vm1201_vm0, %v1229_v33, 0.0 }
 0x1dc   :  { %v1644_v3 = vmul.f32 %v1612_v46, %v1548_v43  ;;  %2145 = vtanh.f32 %v1515_v47  ;;  %v1360_v10 = vadd.f32 %v1261_v52, %v764_v56  ;;  %v1194_v14 = vadd.f32 %v1162_v34, %v1112_v2 }
 0x1dd   :  { %v1646_v57 = vmul.f32 %v1614_v4, %v1550_v36  ;;  %2147 = vtanh.f32 %v1517_v44  ;;  %v1547_v30 = vmul.f32 0.5, %v1387_v40  ;;  %v1294_v50 = vrot.slane %v1192_v24, 1 }
 0x1de   :  { %v1362_v54 = vadd.f32 %v1263_v37, %v766_v48  ;;  %v554_v41 = vmul.f32 %v2354_v60, %v3568_v62  ;;  %v1296_v29 = vrot.slane %v1194_v14, 1  ;;  %v605_v43 = vmul.f32 %v2356_v61, %v3569_v5 }
 0x1df   :  { %v1666_v58 = vpack.c.bf16 %v1646_v57, %v1644_v3  ;;  %v607_v56 = vmul.f32 %v2356_v61, %v3571_v9  ;;  %v1328_v36 = vsel %vm1268_vm1, %v1294_v50, 0.0  ;;  %v556_v15 = vmul.f32 %v2354_v60, %v3569_v5 }
 0x1e0   :  { %v688_v40 = vmul.f32 %v2381_v21, %v3571_v9  ;;  %v690_v48 = vmul.f32 %v2381_v21, %v2745_v45  ;;  %v1330_v27 = vsel %vm1268_vm1, %v1296_v29, 0.0  ;;  %v1392_v53 = vadd.f32 %v1360_v10, %v1328_v36 }
 0x1e1   :  { %1878 = vmatprep.mubr.bf16.mxu1 %v1666_v58  ;;  %v637_v34 = vadd.f32 %v605_v43, %v554_v41  ;;  %v813_v6 = vmul.f32 %v2358_v0, %v3568_v62  ;;  %v1394_v59 = vadd.f32 %v1362_v54, %v1330_v27  ;;  %v639_v46 = vadd.f32 %v607_v56, %v556_v15 }
 0x1e2   :  { %v863_v47 = vmul.f32 %v2362_v8, %v3569_v5  ;;  %v865_v44 = vmul.f32 %v2362_v8, %v3571_v9  ;;  %v1549_v26 = vmul.f32 0.5, %v3226_v51  ;;  %v1424_v21 = vmul.f32 %v1392_v53, %v1392_v53 }
 0x1e3   :  { %v720_v4 = vadd.f32 %v688_v40, %v637_v34  ;;  %v815_v2 = vmul.f32 %v2358_v0, %v3569_v5  ;;  %v1426_v33 = vmul.f32 %v1394_v59, %v1394_v59  ;;  %v3286_v52 = vmul.f32 0.5, %v1392_v53 }
 0x1e4   :  { %v722_v3 = vadd.f32 %v690_v48, %v639_v46  ;;  %v895_v24 = vadd.f32 %v863_v47, %v813_v6  ;;  %v1456_v10 = vmul.f32 0.035677407, %v1424_v21  ;;  %v945_v37 = vmul.f32 %v2383_v22, %v3571_v9 }
 0x1e5   :  { %v763_v57 = vadd.f32 %v2401_v31, %v720_v4  ;;  %v897_v14 = vadd.f32 %v865_v44, %v815_v2  ;;  %v1458_v50 = vmul.f32 0.035677407, %v1426_v33  ;;  %v947_v51 = vmul.f32 %v2383_v22, %v2745_v45 }
 0x1e6   :  { %v1027_v54 = vmul.f32 %v2366_v12, %v3568_v62  ;;  %v1029_v41 = vmul.f32 %v2366_v12, %v3569_v5  ;;  %v1488_v58 = vadd.f32 0.7978846, %v1456_v10  ;;  %v977_v29 = vadd.f32 %v945_v37, %v895_v24 }
 0x1e7   :  { %v1077_v43 = vmul.f32 %v2368_v13, %v3569_v5  ;;  %v1079_v56 = vmul.f32 %v2368_v13, %v3571_v9  ;;  %v1490_v36 = vadd.f32 0.7978846, %v1458_v50  ;;  %v979_v15 = vadd.f32 %v947_v51, %v897_v14 }
 0x1e8   :  { %v1159_v40 = vmul.f32 %v2416_v38, %v3571_v9  ;;  %v1161_v48 = vmul.f32 %v2416_v38, %v2745_v45  ;;  %v1520_v27 = vmul.f32 %v1488_v58, %v1392_v53  ;;  %v1226_v46 = vrot.slane %v977_v29, 7 }
 0x1e9   :  { %v2146_v62 = vpop.eup %2145  ;;  %v1109_v34 = vadd.f32 %v1077_v43, %v1027_v54  ;;  %v1111_v6 = vadd.f32 %v1079_v56, %v1029_v41  ;;  %v1522_v21 = vmul.f32 %v1490_v36, %v1394_v59  ;;  %v765_v5 = vadd.f32 %v2401_v31, %v722_v3 }
 0x1ea   :  { %v2148_v47 = vpop.eup %2147  ;;  %v1611_v44 = vadd.f32 1.0, %v2146_v62  ;;  %v1228_v4 = vrot.slane %v979_v15, 7  ;;  %2149 = vtanh.f32 %v1520_v27  ;;  %v1260_v14 = vsel %vm1201_vm0, %v1226_v46, 0.0 }
 0x1eb   :  { %v1613_v2 = vadd.f32 1.0, %v2148_v47  ;;  %v1191_v33 = vadd.f32 %v1159_v40, %v1109_v34  ;;  %v1193_v24 = vadd.f32 %v1161_v48, %v1111_v6  ;;  %2151 = vtanh.f32 %v1522_v21  ;;  %v3572_v6 = vld [vmem:[#allocation64_spill] sm:$0xff] }
 0x1ec   :  { %v1643_v10 = vmul.f32 %v1611_v44, %v1547_v30  ;;  %v1262_v53 = vsel %vm1201_vm0, %v1228_v4, 0.0  ;;  %v1359_v54 = vadd.f32 %v1260_v14, %v763_v57  ;;  %v559_v3 = vmul.f32 %v2360_v7, %v3570_v49 }
 0x1ed   :  { %v1645_v37 = vmul.f32 %v1613_v2, %v1549_v26  ;;  %v1293_v50 = vrot.slane %v1191_v33, 1  ;;  %v1295_v51 = vrot.slane %v1193_v24, 1  ;;  %v1361_v41 = vadd.f32 %v1262_v53, %v765_v5  ;;  %v3573_v5 = vld [vmem:[#allocation66_spill] sm:$0xff]  ;;  %v3574_v33 = vld [vmem:[#allocation65_spill] sm:$0xff] }
 0x1ee   :  { %v561_v58 = vmul.f32 %v2360_v7, %v2764_v1  ;;  %v610_v30 = vmul.f32 %v2372_v16, %v2764_v1  ;;  %v820_v57 = vmul.f32 %v2364_v11, %v2764_v1  ;;  %v1554_v56 = vmul.f32 0.5, %v1394_v59  ;;  %v3575_v24 = vld [vmem:[#allocation61_spill] sm:$0xff] }
 0x1ef   :  { %v1665_v29 = vpack.c.bf16 %v1645_v37, %v1643_v10  ;;  %v1327_v43 = vsel %vm1268_vm1, %v1293_v50, 0.0  ;;  %v1329_v26 = vsel %vm1268_vm1, %v1295_v51, 0.0  ;;  %v818_v16 = vmul.f32 %v2364_v11, %v3570_v49 }
 0x1f0   :  { %v3322_v36 = vadd.f32 %v1359_v54, %v1327_v43  ;;  %v3324_v15 = vadd.f32 %v1361_v41, %v1329_v26  ;;  %v644_v7 = vadd.f32 %v2804_v55, %v561_v58  ;;  %v642_v40 = vadd.f32 %v610_v30, %v559_v3 }
 0x1f1   :  { %1879 = vmatmul.mubr.bf16.gmra.mxu1 %v1665_v29  ;;  %v868_v48 = vmul.f32 %v2374_v17, %v2764_v1  ;;  %v902_v62 = vadd.f32 %v2814_v39, %v820_v57  ;;  %v1032_v34 = vmul.f32 %v2376_v18, %v3570_v49  ;;  %v1034_v55 = vmul.f32 %v2376_v18, %v2764_v1 }
 0x1f2   :  { %v1423_v27 = vmul.f32 %v3322_v36, %v3322_v36  ;;  %v1425_v59 = vmul.f32 %v3324_v15, %v3324_v15  ;;  %v725_v46 = vadd.f32 %v3572_v6, %v642_v40  ;;  %v727_v11 = vadd.f32 %v3530_v63, %v644_v7 }
 0x1f3   :  { %v900_v47 = vadd.f32 %v868_v48, %v818_v16  ;;  %v984_v17 = vadd.f32 %v3531_v20, %v902_v62  ;;  %v1082_v21 = vmul.f32 %v2385_v23, %v2764_v1  ;;  %v1116_v4 = vadd.f32 %v3573_v5, %v1034_v55 }
 0x1f4   :  { %v1455_v39 = vmul.f32 0.035677407, %v1423_v27  ;;  %v1457_v44 = vmul.f32 0.035677407, %v1425_v59  ;;  %v768_v2 = vadd.f32 %v2408_v35, %v725_v46  ;;  %v770_v49 = vadd.f32 %v2408_v35, %v727_v11  ;;  %v3576_v27 = vld [vmem:[#allocation60_spill] sm:$0xff]  ;;  %v3578_v11 = vld [vmem:[#allocation62_spill] sm:$0xff] }
 0x1f5   :  { %v982_v18 = vadd.f32 %v3574_v33, %v900_v47  ;;  %v1164_v10 = vmul.f32 %v2403_v32, %v3575_v24  ;;  %v1114_v53 = vadd.f32 %v1082_v21, %v1032_v34  ;;  %v1198_v20 = vadd.f32 %v3535_v25, %v1116_v4  ;;  %v3577_v34 = vld [vmem:[#allocation59_spill] sm:$0xff] }
 0x1f6   :  { %v1487_v63 = vadd.f32 0.7978846, %v1455_v39  ;;  %v1489_v14 = vadd.f32 0.7978846, %v1457_v44  ;;  %v1233_v50 = vrot.slane %v984_v17, 7  ;;  %v558_v23 = vmul.f32 %v2354_v60, %v3571_v9 }
 0x1f7   :  { %v1231_v37 = vrot.slane %v982_v18, 7  ;;  %v560_v1 = vmul.f32 %v2354_v60, %v2745_v45  ;;  %v2150_v51 = vpop.eup %2149  ;;  %v1196_v41 = vadd.f32 %v1164_v10, %v1114_v53  ;;  %v1300_v32 = vrot.slane %v1198_v20, 1 }
 0x1f8   :  { %v1519_v35 = vmul.f32 %v1487_v63, %v3322_v36  ;;  %v1521_v54 = vmul.f32 %v1489_v14, %v3324_v15  ;;  %v2152_v3 = vpop.eup %2151  ;;  %v1616_v58 = vadd.f32 1.0, %v2150_v51  ;;  %v1267_v30 = vsel %vm1201_vm0, %v1233_v50, 0.0  ;;  %v3580_v51 = vld [vmem:[#allocation27_spill] sm:$0xff] }
 0x1f9   :  { %v1265_v25 = vsel %vm1201_vm0, %v1231_v37, 0.0  ;;  %v609_v29 = vmul.f32 %v2356_v61, %v2745_v45  ;;  %v1618_v43 = vadd.f32 1.0, %v2152_v3  ;;  %v1298_v60 = vrot.slane %v1196_v41, 1 }
 0x1fa   :  { %2153 = vtanh.f32 %v1519_v35  ;;  %v1334_v26 = vsel %vm1268_vm1, %v1300_v32, 0.0  ;;  %v1648_v57 = vmul.f32 %v1616_v58, %v3286_v52  ;;  %v1364_v7 = vadd.f32 %v1265_v25, %v768_v2  ;;  %v3579_v2 = vld [vmem:[#allocation63_spill] sm:$0xff] }
 0x1fb   :  { %2155 = vtanh.f32 %v1521_v54  ;;  %v1366_v40 = vadd.f32 %v1267_v30, %v770_v49  ;;  %v1650_v16 = vmul.f32 %v1618_v43, %v1554_v56  ;;  %v1332_v48 = vsel %vm1268_vm1, %v1298_v60, 0.0 }
 0x1fc   :  { %v641_v62 = vadd.f32 %v609_v29, %v558_v23  ;;  %v643_v59 = vadd.f32 %v3576_v27, %v560_v1  ;;  %v949_v61 = vmul.f32 %v2383_v22, %v3577_v34  ;;  %v3372_v55 = vadd.f32 %v1364_v7, %v1332_v48 }
 0x1fd   :  { %v3374_v6 = vadd.f32 %v1366_v40, %v1334_v26  ;;  %v817_v52 = vmul.f32 %v2358_v0, %v3571_v9  ;;  %v1668_v46 = vpack.c.bf16 %v1650_v16, %v1648_v57  ;;  %v819_v56 = vmul.f32 %v2358_v0, %v2745_v45 }
 0x1fe   :  { %v724_v47 = vadd.f32 %v3578_v11, %v641_v62  ;;  %v867_v17 = vmul.f32 %v2362_v8, %v2745_v45  ;;  %v1083_v39 = vmul.f32 %v2368_v13, %v3577_v34  ;;  %v1428_v22 = vmul.f32 %v3372_v55, %v3372_v55 }
 0x1ff   :  { %v1430_v44 = vmul.f32 %v3374_v6, %v3374_v6  ;;  %v726_v21 = vadd.f32 %v3538_v28, %v643_v59  ;;  %1886 = vmatprep.mubr.bf16.mxu1 %v1668_v46  ;;  %v901_v0 = vadd.f32 %v3579_v2, %v819_v56  ;;  %v1031_v8 = vmul.f32 %v2366_v12, %v3571_v9 }
 0x200   :  { %v767_v5 = vadd.f32 %v2401_v31, %v724_v47  ;;  %v899_v4 = vadd.f32 %v867_v17, %v817_v52  ;;  %v1460_v49 = vmul.f32 0.035677407, %v1428_v22  ;;  %v1033_v18 = vmul.f32 %v2366_v12, %v2745_v45 }
 0x201   :  { %v1462_v33 = vmul.f32 0.035677407, %v1430_v44  ;;  %v983_v10 = vadd.f32 %v3541_v19, %v901_v0  ;;  %v1081_v28 = vmul.f32 %v2368_v13, %v2745_v45  ;;  %v1163_v63 = vmul.f32 %v2416_v38, %v3577_v34  ;;  %v3420_v44 = vld [vmem:[%s3450_s6] ss:$0 sm:$0xff]  ;;  %s2282_s6 = smov [#allocation11]  }
 0x202   :  { %v981_v24 = vadd.f32 %v949_v61, %v899_v4  ;;  %v1492_v14 = vadd.f32 0.7978846, %v1460_v49  ;;  %v769_v20 = vadd.f32 %v2401_v31, %v726_v21  ;;  %v1115_v37 = vadd.f32 %v1083_v39, %v1033_v18  ;;  %s1924_s25 = sshll.u32 %s2282_s6, 4  ;;  %s1925_s25 = int_to_ptr.vmem [resolvable:$true] %s1924_s25 }
 0x203   :  { %v1494_v53 = vadd.f32 0.7978846, %v1462_v33  ;;  %v1113_v50 = vadd.f32 %v1081_v28, %v1031_v8  ;;  %v1232_v9 = vrot.slane %v983_v10, 7  ;;  %v1551_v25 = vmul.f32 0.5, %v3322_v36  ;;  %s2245_s26 = scalar_lea.vmem %s1925_s25, 2048  ;;  %p2250_p7 = scmp.lt.s32.totalorder %s1925_s25, %s1925_s25 }
 0x204   :  { %v1230_v23 = vrot.slane %v981_v24, 7  ;;  %v1524_v1 = vmul.f32 %v1492_v14, %v3372_v55  ;;  %v1197_v19 = vadd.f32 %v3580_v51, %v1115_v37  ;;  %v1553_v30 = vmul.f32 0.5, %v3324_v15  ;;  %p2246_p6 = scmp.ne.s32.totalorder %s1925_s25, %s2245_s26  ;;  %p2251_p8 = scmp.lt.s32.totalorder %s2245_s26, %s2245_s26 }
 0x205   :  { %v1526_v12 = vmul.f32 %v1494_v53, %v3374_v6  ;;  %v1195_v35 = vadd.f32 %v1163_v63, %v1113_v50  ;;  %v1266_v38 = vsel %vm1201_vm0, %v1232_v9, 0.0  ;;  %v1556_v42 = vmul.f32 0.5, %v3372_v55 }
 0x206   :  { %v1264_v13 = vsel %vm1201_vm0, %v1230_v23, 0.0  ;;  %2157 = vtanh.f32 %v1524_v1  ;;  %v1299_v31 = vrot.slane %v1197_v19, 1  ;;  %v1365_v41 = vadd.f32 %v1266_v38, %v769_v20  ;;  %p2252_p9 = por %p2251_p8, %p2250_p7 }
 0x207   :  { %v2154_v45 = vpop.eup %2153  ;;  %v1363_v54 = vadd.f32 %v1264_v13, %v767_v5  ;;  %2159 = vtanh.f32 %v1526_v12  ;;  %v1297_v58 = vrot.slane %v1195_v35, 1  ;;  %v1558_v47 = vmul.f32 0.5, %v3374_v6 }
 0x208   :  { %v2156_v32 = vpop.eup %2155  ;;  %v1615_v3 = vadd.f32 1.0, %v2154_v45  ;;  %v1333_v43 = vsel %vm1268_vm1, %v1299_v31, 0.0  ;;  %p2253_p10 = pnand %p2252_p9, %p2246_p6 }
 0x209   :  { %v1617_v29 = vadd.f32 1.0, %v2156_v32  ;;  %v1331_v60 = vsel %vm1268_vm1, %v1297_v58, 0.0  ;;  %v1397_v26 = vadd.f32 %v1365_v41, %v1333_v43 }
 0x20a   :  { %v1647_v57 = vmul.f32 %v1615_v3, %v1551_v25  ;;  %v1395_v40 = vadd.f32 %v1363_v54, %v1331_v60 }
 0x20b   :  { %v1649_v7 = vmul.f32 %v1617_v29, %v1553_v30  ;;  %v1429_v16 = vmul.f32 %v1397_v26, %v1397_v26  ;;  %v1557_v18 = vmul.f32 0.5, %v1397_v26 }
 0x20c   :  { %v1427_v62 = vmul.f32 %v1395_v40, %v1395_v40  ;;  %v1555_v10 = vmul.f32 0.5, %v1395_v40 }
 0x20d   :  { %v1667_v48 = vpack.c.bf16 %v1649_v7, %v1647_v57  ;;  %v1461_v27 = vmul.f32 0.035677407, %v1429_v16 }
 0x20e   :  { %v1459_v59 = vmul.f32 0.035677407, %v1427_v62 }
 0x20f   :  { %1887 = vmatmul.mubr.bf16.gmra.mxu1 %v1667_v48  ;;  %v1493_v36 = vadd.f32 0.7978846, %v1461_v27 }
 0x210   :  { %v1491_v34 = vadd.f32 0.7978846, %v1459_v59 }
 0x211   :  { %v1525_v15 = vmul.f32 %v1493_v36, %v1397_v26 }
 0x212   :  { %v1523_v61 = vmul.f32 %v1491_v34, %v1395_v40 }
 0x213   :  { %v2158_v52 = vpop.eup %2157  ;;  %2161 = vtanh.f32 %v1525_v15 }
 0x214   :  { %v2160_v46 = vpop.eup %2159  ;;  %v1620_v11 = vadd.f32 1.0, %v2158_v52  ;;  %2163 = vtanh.f32 %v1523_v61 }
 0x215   :  { %v1622_v56 = vadd.f32 1.0, %v2160_v46 }
 0x216   :  { %v1995_v17 = vpop.f32.mrf.mxu1  ;;  %v1652_v39 = vmul.f32 %v1620_v11, %v1556_v42 }
 0x217   :  { %v1654_v22 = vmul.f32 %v1622_v56, %v1558_v47 }
 0x218   :  { %v1996_v21 = vpop.f32.mrf.mxu1 }
 0x219   :  { %v1997_v5 = vadd.f32 %v1996_v21, %v1995_v17  ;;  %v1670_v4 = vpack.c.bf16 %v1654_v22, %v1652_v39 }
 0x21a   :  { %v1998_v2 = vpop.f32.mrf.mxu1 }
 0x21b   :  { %v1841_v0 = vadd.f32 %v1997_v5, %v3420_v44  ;;  %1894 = vmatprep.mubr.bf16.mxu1 %v1670_v4 }
 0x21c   :  { %v1999_v49 = vpop.f32.mrf.mxu1 }
 0x21d   :  { %1903 = vst [vmem:[#allocation11] sm:$0xff] %v1841_v0  ;;  %v2000_v55 = vadd.f32 %v1999_v49, %v1998_v2 }
 0x21f   :  { %v1844_v6 = vadd.f32 %v2000_v55, %v3420_v44 }
 0x220   :  { %v2162_v33 = vpop.eup %2161 }
 0x221   :  { %1904 = vst [vmem:[#allocation11 + $0x8] sm:$0xff] %v1844_v6  ;;  %v2164_v8 = vpop.eup %2163  ;;  %v1621_v24 = vadd.f32 1.0, %v2162_v33 }
 0x222   :  { %v1619_v28 = vadd.f32 1.0, %v2164_v8 }
 0x223   :  { %v1653_v63 = vmul.f32 %v1621_v24, %v1557_v18 }
 0x224   :  { %v1651_v14 = vmul.f32 %v1619_v28, %v1555_v10 }
 0x226   :  { %v1669_v53 = vpack.c.bf16 %v1653_v63, %v1651_v14 }
 0x228   :  { %1895 = vmatmul.mubr.bf16.gmra.mxu1 %v1669_v53 }
 0x23e   :  { %v2001_v20 = vpop.f32.mrf.mxu1 }
 0x240   :  { %v2002_v37 = vpop.f32.mrf.mxu1 }
 0x241   :  { %v2003_v50 = vadd.f32 %v2002_v37, %v2001_v20 }
 0x242   :  { %v2004_v23 = vpop.f32.mrf.mxu1 }
 0x243   :  { %v1849_v9 = vadd.f32 %v2003_v50, %v3420_v44 }
 0x244   :  { %v2005_v1 = vpop.f32.mrf.mxu1 }
 0x245   :  { %1905 = vst [vmem:[#allocation11 + $0x10] sm:$0xff] %v1849_v9  ;;  %v2006_v12 = vadd.f32 %v2005_v1, %v2004_v23 }
 0x247   :  { %v1852_v51 = vadd.f32 %v2006_v12, %v3420_v44 }
 0x249   :  { %1906 = vst [vmem:[#allocation11 + $0x18] sm:$0xff] %v1852_v51 }
 0x25d   :  { %v2007_v19 = vpop.f32.mrf.mxu1 }
 0x25f   :  { %v2008_v35 = vpop.f32.mrf.mxu1 }
 0x260   :  { %v2009_v13 = vadd.f32 %v2008_v35, %v2007_v19 }
 0x261   :  { %v2010_v38 = vpop.f32.mrf.mxu1 }
 0x262   :  { %v1857_v45 = vadd.f32 %v2009_v13, %v3420_v44 }
 0x263   :  { %v2011_v31 = vpop.f32.mrf.mxu1 }
 0x264   :  { %1907 = vst [vmem:[#allocation11 + $0x20] sm:$0xff] %v1857_v45  ;;  %v2012_v54 = vadd.f32 %v2011_v31, %v2010_v38 }
 0x266   :  { %v1860_v41 = vadd.f32 %v2012_v54, %v3420_v44 }
 0x268   :  { %1908 = vst [vmem:[#allocation11 + $0x28] sm:$0xff] %v1860_v41 }
 0x277   :  { %v2013_v32 = vpop.f32.mrf.mxu1 }
 0x279   :  { %v2014_v3 = vpop.f32.mrf.mxu1 }
 0x27a   :  { %v2015_v58 = vadd.f32 %v2014_v3, %v2013_v32 }
 0x27b   :  { %v2016_v25 = vpop.f32.mrf.mxu1 }
 0x27c   :  { %v1865_v30 = vadd.f32 %v2015_v58, %v3420_v44 }
 0x27d   :  { %v2017_v29 = vpop.f32.mrf.mxu1 }
 0x27e   :  { %1909 = vst [vmem:[#allocation11 + $0x30] sm:$0xff] %v1865_v30  ;;  %v2018_v43 = vadd.f32 %v2017_v29, %v2016_v25 }
 0x280   :  { %v1868_v60 = vadd.f32 %v2018_v43, %v3420_v44 }
 0x282   :  { %1910 = vst [vmem:[#allocation11 + $0x38] sm:$0xff] %v1868_v60 }
 0x291   :  { %v2019_v26 = vpop.f32.mrf.mxu1 }
 0x293   :  { %v2020_v57 = vpop.f32.mrf.mxu1 }
 0x294   :  { %v2021_v7 = vadd.f32 %v2020_v57, %v2019_v26 }
 0x295   :  { %v2022_v40 = vpop.f32.mrf.mxu1 }
 0x296   :  { %v1873_v16 = vadd.f32 %v2021_v7, %v3420_v44 }
 0x297   :  { %v2023_v48 = vpop.f32.mrf.mxu1 }
 0x298   :  { %1911 = vst [vmem:[#allocation11 + $0x40] sm:$0xff] %v1873_v16  ;;  %v2024_v62 = vadd.f32 %v2023_v48, %v2022_v40 }
 0x29a   :  { %v1876_v27 = vadd.f32 %v2024_v62, %v3420_v44 }
 0x29c   :  { %1912 = vst [vmem:[#allocation11 + $0x48] sm:$0xff] %v1876_v27 }
 0x2b1   :  { %v2025_v59 = vpop.f32.mrf.mxu1 }
 0x2b3   :  { %v2026_v36 = vpop.f32.mrf.mxu1 }
 0x2b4   :  { %v2027_v34 = vadd.f32 %v2026_v36, %v2025_v59 }
 0x2b5   :  { %v2028_v15 = vpop.f32.mrf.mxu1 }
 0x2b6   :  { %v1881_v61 = vadd.f32 %v2027_v34, %v3420_v44 }
 0x2b7   :  { %v2029_v52 = vpop.f32.mrf.mxu1 }
 0x2b8   :  { %1913 = vst [vmem:[#allocation11 + $0x50] sm:$0xff] %v1881_v61  ;;  %v2030_v46 = vadd.f32 %v2029_v52, %v2028_v15 }
 0x2ba   :  { %v1884_v11 = vadd.f32 %v2030_v46, %v3420_v44 }
 0x2bc   :  { %1914 = vst [vmem:[#allocation11 + $0x58] sm:$0xff] %v1884_v11 }
 0x2cf   :  { %v2031_v42 = vpop.f32.mrf.mxu1 }
 0x2d1   :  { %v2032_v47 = vpop.f32.mrf.mxu1 }
 0x2d2   :  { %v2033_v56 = vadd.f32 %v2032_v47, %v2031_v42 }
 0x2d3   :  { %v2034_v17 = vpop.f32.mrf.mxu1 }
 0x2d4   :  { %v1889_v39 = vadd.f32 %v2033_v56, %v3420_v44 }
 0x2d5   :  { %v2035_v22 = vpop.f32.mrf.mxu1 }
 0x2d6   :  { %1915 = vst [vmem:[#allocation11 + $0x60] sm:$0xff] %v1889_v39  ;;  %v2036_v21 = vadd.f32 %v2035_v22, %v2034_v17 }
 0x2d8   :  { %v1892_v5 = vadd.f32 %v2036_v21, %v3420_v44 }
 0x2da   :  { %1916 = vst [vmem:[#allocation11 + $0x68] sm:$0xff] %v1892_v5 }
 0x2e8   :  { %v2037_v4 = vpop.f32.mrf.mxu1 }
 0x2ea   :  { %v2038_v2 = vpop.f32.mrf.mxu1 }
 0x2eb   :  { %v2039_v0 = vadd.f32 %v2038_v2, %v2037_v4 }
 0x2ec   :  { %v2040_v49 = vpop.f32.mrf.mxu1 }
 0x2ed   :  { %v1897_v55 = vadd.f32 %v2039_v0, %v3420_v44 }
 0x2ee   :  { %v2041_v6 = vpop.f32.mrf.mxu1 }
 0x2ef   :  { %1917 = vst [vmem:[#allocation11 + $0x70] sm:$0xff] %v1897_v55  ;;  %v2042_v33 = vadd.f32 %v2041_v6, %v2040_v49 }
 0x2f1   :  { %v1900_v8 = vadd.f32 %v2042_v33, %v3420_v44 }
 0x2f3   :  { %1918 = vst [vmem:[#allocation11 + $0x78] sm:$0xff] %v1900_v8 }
 0x2f4   :  { %2256 = shalt.err (!%p2253_p10)
}
 0x2f5   :  { %1930 = dma.vmem_to_hbm [thread:$0]  %s1925_s25, 2048, %s3451_s7, [#allocation5], %s2274_s27, %s2274_s27, %s2275_s28  }
 0x2f6   :  { %2271 = dma.done.wait [#allocation5], 2048  }
 0x2f7   :  { %2272 = vsyncadd [#allocation5], 4294965248 }
 0x2f8   :  { %1934 = vsyncpa [#allocation4], 1 }
 0x2f9   :  { %1935 = vsyncpa [#allocation7], 1 }
 0x2fa   :  { %1936 = vsyncpa [#allocation10], 1 }
 0x2fb   :  { %1937 = vsyncpa [#allocation5], 1 }

</bundles_post_ra>
